<compile_context>
chip_gen: v6e
topology: v6e:2x2x1
jax: 0.10.0
libtpu: 0.0.40
codegen_flags: <defaults>
</compile_context>

<pallas_src>
import jax
import jax.numpy as jnp
from jax import lax
from jax.experimental import pallas as pl
from jax.experimental.pallas import tpu as pltpu

# ----------------------------- model config ---------------------------------
VOCAB = 100            # synthetic vocab
S = 8                  # sequence length (== max_length)
H = 32                 # hidden size
NHEADS = 2
DH = H // NHEADS       # head dim
FFN = 64               # intermediate size
NLAYERS = 2
LN_EPS = 1e-12         # BERT/RoBERTa LayerNorm eps
MASK_BIAS = -10000.0   # HF-style additive key-padding bias
ATT_SCALE = float(DH) ** -0.5


# ------------------------------ kernel ---------------------------------------
def _layer_norm(x, g, b):
    mean = jnp.mean(x, axis=-1, keepdims=True)
    xc = x - mean
    var = jnp.mean(xc * xc, axis=-1, keepdims=True)
    return xc * lax.rsqrt(var + LN_EPS) * g + b


def _make_kernel(BB):
    """Build the fused encoder kernel for a block of BB examples."""
    MB = BB * S  # tokens per grid step

    def kernel(ids_ref,      # (1, MB, 1) int32   token ids (this block)
               mask_ref,     # (1, BB, S) int32   attention mask (this block)
               wemb_ref,     # (VOCAB, H) f32     word embedding table
               pos_ref,      # (S, H)     f32
               typ_ref,      # (1, H)     f32
               emb_g_ref, emb_b_ref,            # (1, H) f32
               wqkv_ref,     # (L, H, 3H) bf16   fused Q|K|V weights
               bqkv_ref,     # (L, 1, 3H) f32
               wo_ref,       # (L, H, H)  bf16
               bo_ref,       # (L, 1, H)  f32
               ln1_g_ref, ln1_b_ref,            # (L, 1, H) f32
               w1_ref,       # (L, H, FFN) bf16
               b1_ref,       # (L, 1, FFN) f32
               w2_ref,       # (L, FFN, H) bf16
               b2_ref,       # (L, 1, H)   f32
               ln2_g_ref, ln2_b_ref,            # (L, 1, H) f32
               out_ref,      # (1, BB, H) f32    CLS embeddings (this block)
               ctx_ref):     # (MB, H)    f32    VMEM scratch for attn context
        # ---- fused embedding: one-hot gather on the MXU (no XLA gather) ----
        ids = ids_ref[0]                                              # (MB, 1)
        onehot = (ids == lax.broadcasted_iota(jnp.int32, (MB, VOCAB), 1)
                  ).astype(jnp.float32)                               # (MB, VOCAB)
        x = jnp.dot(onehot, wemb_ref[...],
                    preferred_element_type=jnp.float32)               # (MB, H)
        pos = pos_ref[...]
        pos_tiled = pos if BB == 1 else jnp.concatenate([pos] * BB, axis=0)
        # TODO(synk): CamemBERT uses padding-offset position ids; absolute
        # 0..S-1 positions are used for this synthetic model.
        x = x + pos_tiled + typ_ref[...]
        h = _layer_norm(x, emb_g_ref[...], emb_b_ref[...])            # (MB, H) f32

        # additive key-padding bias, computed in-kernel
        mask = mask_ref[0].astype(jnp.float32)                        # (BB, S)
        bias = (1.0 - mask) * MASK_BIAS                               # (BB, S)

        for l in range(NLAYERS):                 # static unroll (NLAYERS=2)
            # ---- self-attention block (post-LN, BERT/RoBERTa style) ----
            qkv = jnp.dot(h.astype(jnp.bfloat16), wqkv_ref[l],
                          preferred_element_type=jnp.float32) + bqkv_ref[l]
            q = qkv[:, 0 * H:1 * H]
            k = qkv[:, 1 * H:2 * H]
            v = qkv[:, 2 * H:3 * H]

            # scores for every (example, head) pair stacked along sublanes so
            # the softmax statistics are ONE wide reduce per layer.
            rows = []
            for b in range(BB):
                rb = bias[b:b + 1, :]                                 # (1, S)
                for hh in range(NHEADS):
                    qs = q[b * S:(b + 1) * S,
                           hh * DH:(hh + 1) * DH].astype(jnp.bfloat16)
                    ks = k[b * S:(b + 1) * S,
                           hh * DH:(hh + 1) * DH].astype(jnp.bfloat16)
                    s = lax.dot_general(qs, ks, (((1,), (1,)), ((), ())),
                                        preferred_element_type=jnp.float32)
                    rows.append(s * ATT_SCALE + rb)                   # (S, S)
            scores = jnp.concatenate(rows, axis=0)        # (BB*NHEADS*S, S) f32
            mx = jnp.max(scores, axis=-1, keepdims=True)
            p = jnp.exp(scores - mx)
            denom = jnp.sum(p, axis=-1, keepdims=True)
            p = p * pl.reciprocal(denom, approx=True)     # EUP divide

            # per-head context written straight into a VMEM scratch slab
            # (no lane-axis concatenation)
            for b in range(BB):
                for hh in range(NHEADS):
                    idx = b * NHEADS + hh
                    ps = p[idx * S:(idx + 1) * S, :].astype(jnp.bfloat16)
                    vs = v[b * S:(b + 1) * S,
                           hh * DH:(hh + 1) * DH].astype(jnp.bfloat16)
                    ctx_ref[b * S:(b + 1) * S, hh * DH:(hh + 1) * DH] = jnp.dot(
                        ps, vs, preferred_element_type=jnp.float32)

            attn = jnp.dot(ctx_ref[...].astype(jnp.bfloat16), wo_ref[l],
                           preferred_element_type=jnp.float32) + bo_ref[l]
            h = _layer_norm(attn + h, ln1_g_ref[l], ln1_b_ref[l])

            # ---- feed-forward block ----
            f = jnp.dot(h.astype(jnp.bfloat16), w1_ref[l],
                        preferred_element_type=jnp.float32) + b1_ref[l]
            # TODO(synk): HF CamemBERT gelu is erf-based; tanh approximation
            # used here for guaranteed Mosaic/EUP lowering.
            f = jax.nn.gelu(f, approximate=True)
            f = jnp.dot(f.astype(jnp.bfloat16), w2_ref[l],
                        preferred_element_type=jnp.float32) + b2_ref[l]
            h = _layer_norm(f + h, ln2_g_ref[l], ln2_b_ref[l])

        # emit ONLY the CLS rows (token 0 of each example in this block)
        cls = jnp.concatenate([h[b * S:b * S + 1, :] for b in range(BB)], axis=0)
        out_ref[0] = cls.astype(out_ref.dtype)

    return kernel


# --------------------------- pallas_call wrapper ------------------------------
def _resident_spec(shape):
    """Full-array block, same for every grid step (weights stay resident)."""
    n = len(shape)
    return pl.BlockSpec(tuple(shape), lambda i, _n=n: (0,) * _n)


def encoder_stacked(params, ids_stacked, mask_stacked):
    """ids/mask: (NB, BB, S) int32 -> CLS embeddings (NB, BB, H) f32.

    One fused pallas_call for the whole encoder. grid=(NB,) is marked
    "parallel" so v7x can run each block of examples on its own TensorCore.
    """
    NB, BB, s_ = ids_stacked.shape
    assert s_ == S
    MB = BB * S

    # tokens along sublanes, lane dim 1 (free metadata reshape in XLA)
    ids3 = ids_stacked.reshape(NB, MB, 1).astype(jnp.int32)
    mask3 = mask_stacked.astype(jnp.int32)                       # (NB, BB, S)

    weights = [
        params["word_emb"], params["pos_emb"], params["type_emb"],
        params["emb_ln_g"], params["emb_ln_b"],
        params["wqkv"], params["bqkv"],
        params["wo"], params["bo"],
        params["ln1_g"], params["ln1_b"],
        params["w1"], params["b1"],
        params["w2"], params["b2"],
        params["ln2_g"], params["ln2_b"],
    ]
    in_specs = (
        [pl.BlockSpec((1, MB, 1), lambda i: (i, 0, 0)),   # ids for this block
         pl.BlockSpec((1, BB, S), lambda i: (i, 0, 0))]   # mask for this block
        + [_resident_spec(w.shape) for w in weights]
    )

    return pl.pallas_call(
        _make_kernel(BB),
        out_shape=jax.ShapeDtypeStruct((NB, BB, H), jnp.float32),
        grid=(NB,),
        in_specs=in_specs,
        out_specs=pl.BlockSpec((1, BB, H), lambda i: (i, 0, 0)),
        scratch_shapes=[pltpu.VMEM((MB, H), jnp.float32)],
        compiler_params=pltpu.CompilerParams(
            dimension_semantics=("parallel",)),
    )(ids3, mask3, *weights)


# ------------------------------ parameters -----------------------------------
def init_params(key):
    def w(k, shape, scale=0.02, dtype=jnp.float32):
        return (scale * jax.random.normal(k, shape, dtype=jnp.float32)).astype(dtype)

    keys = iter(jax.random.split(key, 8))
    bf16 = jnp.bfloat16
    return {
        "word_emb": w(next(keys), (VOCAB, H)),
        "pos_emb": w(next(keys), (S, H)),
        "type_emb": w(next(keys), (1, H)),
        "emb_ln_g": jnp.ones((1, H), jnp.float32),
        "emb_ln_b": jnp.zeros((1, H), jnp.float32),
        # matmul weights bf16 (MXU-native); biases / LN params f32
        "wqkv": w(next(keys), (NLAYERS, H, 3 * H), dtype=bf16),
        "bqkv": jnp.zeros((NLAYERS, 1, 3 * H), jnp.float32),
        "wo": w(next(keys), (NLAYERS, H, H), dtype=bf16),
        "bo": jnp.zeros((NLAYERS, 1, H), jnp.float32),
        "ln1_g": jnp.ones((NLAYERS, 1, H), jnp.float32),
        "ln1_b": jnp.zeros((NLAYERS, 1, H), jnp.float32),
        "w1": w(next(keys), (NLAYERS, H, FFN), dtype=bf16),
        "b1": jnp.zeros((NLAYERS, 1, FFN), jnp.float32),
        "w2": w(next(keys), (NLAYERS, FFN, H), dtype=bf16),
        "b2": jnp.zeros((NLAYERS, 1, H), jnp.float32),
        "ln2_g": jnp.ones((NLAYERS, 1, H), jnp.float32),
        "ln2_b": jnp.zeros((NLAYERS, 1, H), jnp.float32),
    }


# ------------------------------ forward pass ---------------------------------
@jax.jit
def siamese_forward(params, input_ids, attention_mask):
    """SiameseNetwork.forward equivalent: CLS embedding (B, H) for one tower."""
    bt = input_ids.shape[0]
    nb = 2 if (bt >= 2 and bt % 2 == 0) else 1       # >=2 blocks -> v7x 2nd TC
    bb = bt // nb
    ids = input_ids.reshape(nb, bb, S)
    msk = attention_mask.reshape(nb, bb, S)
    cls = encoder_stacked(params, ids, msk)           # (nb, bb, H)
    return cls.reshape(bt, H)


@jax.jit
def siamese_forward_pair(params, ids_a, mask_a, ids_b, mask_b):
    """Both Siamese towers in a SINGLE pallas_call (shared weights)."""
    ids = jnp.stack([ids_a, ids_b])                   # (2, B, S)
    msk = jnp.stack([mask_a, mask_b])
    cls = encoder_stacked(params, ids, msk)           # (2, B, H)
    return cls[0], cls[1]


# ---------------------------------- main --------------------------------------
if __name__ == "__main__":
    key = jax.random.PRNGKey(0)
    pkey, ikey_a, ikey_b = jax.random.split(key, 3)
    params = init_params(pkey)

    B = 2
    ids_a = jax.random.randint(ikey_a, (B, S), 0, VOCAB, dtype=jnp.int32)
    ids_b = jax.random.randint(ikey_b, (B, S), 0, VOCAB, dtype=jnp.int32)
    mask_a = jnp.array([[1, 1, 1, 1, 1, 1, 1, 1],
                        [1, 1, 1, 1, 1, 0, 0, 0]], dtype=jnp.int32)
    mask_b = jnp.array([[1, 1, 1, 1, 1, 1, 1, 0],
                        [1, 1, 1, 1, 0, 0, 0, 0]], dtype=jnp.int32)

    # Module-equivalent forward (one tower).
    cls_a = jax.block_until_ready(siamese_forward(params, ids_a, mask_a))
    assert cls_a.shape == (B, H) and cls_a.dtype == jnp.float32

    # Both Siamese towers fused into a single launch.
    out_a, out_b = siamese_forward_pair(params, ids_a, mask_a, ids_b, mask_b)
    out_a, out_b = jax.block_until_ready((out_a, out_b))
    assert out_a.shape == (B, H) and out_b.shape == (B, H)

    # Single-tower and paired paths must agree (same math, different blocking).
    assert jnp.allclose(cls_a, out_a, atol=1e-2, rtol=1e-2), "tower mismatch"
    assert bool(jnp.all(jnp.isfinite(out_a)) and jnp.all(jnp.isfinite(out_b)))

    print("KERNEL_OK")
</pallas_src>

<mosaic_0001>
module attributes {stable_mosaic.version = 11 : i64} {
  func.func @kernel(%arg0: i32, %arg1: memref<1x8x1xi32, #tpu.memory_space<vmem>>, %arg2: memref<1x1x8xi32, #tpu.memory_space<vmem>>, %arg3: memref<100x32xf32, #tpu.memory_space<vmem>>, %arg4: memref<8x32xf32, #tpu.memory_space<vmem>>, %arg5: memref<1x32xf32, #tpu.memory_space<vmem>>, %arg6: memref<1x32xf32, #tpu.memory_space<vmem>>, %arg7: memref<1x32xf32, #tpu.memory_space<vmem>>, %arg8: memref<2x32x96xbf16, #tpu.memory_space<vmem>>, %arg9: memref<2x1x96xf32, #tpu.memory_space<vmem>>, %arg10: memref<2x32x32xbf16, #tpu.memory_space<vmem>>, %arg11: memref<2x1x32xf32, #tpu.memory_space<vmem>>, %arg12: memref<2x1x32xf32, #tpu.memory_space<vmem>>, %arg13: memref<2x1x32xf32, #tpu.memory_space<vmem>>, %arg14: memref<2x32x64xbf16, #tpu.memory_space<vmem>>, %arg15: memref<2x1x64xf32, #tpu.memory_space<vmem>>, %arg16: memref<2x64x32xbf16, #tpu.memory_space<vmem>>, %arg17: memref<2x1x32xf32, #tpu.memory_space<vmem>>, %arg18: memref<2x1x32xf32, #tpu.memory_space<vmem>>, %arg19: memref<2x1x32xf32, #tpu.memory_space<vmem>>, %arg20: memref<1x1x32xf32, #tpu.memory_space<vmem>>, %arg21: memref<8x32xf32, #tpu.memory_space<vmem>>) attributes {dimension_semantics = [#tpu.dimension_semantics<parallel>], iteration_bounds = array<i64: 2>, scalar_prefetch = 0 : i64, scratch_operands = 1 : i64, tpu.core_type = #tpu.core_type<tc>, window_params = [{transform_indices = @transform_0, window_bounds = array<i64: 1, 8, 1>}, {transform_indices = @transform_1, window_bounds = array<i64: 1, 1, 8>}, {pipeline_mode = #tpu.pipeline_mode<synchronous>, transform_indices = @transform_2, window_bounds = array<i64: 100, 32>}, {pipeline_mode = #tpu.pipeline_mode<synchronous>, transform_indices = @transform_3, window_bounds = array<i64: 8, 32>}, {pipeline_mode = #tpu.pipeline_mode<synchronous>, transform_indices = @transform_4, window_bounds = array<i64: 1, 32>}, {pipeline_mode = #tpu.pipeline_mode<synchronous>, transform_indices = @transform_5, window_bounds = array<i64: 1, 32>}, {pipeline_mode = #tpu.pipeline_mode<synchronous>, transform_indices = @transform_6, window_bounds = array<i64: 1, 32>}, {pipeline_mode = #tpu.pipeline_mode<synchronous>, transform_indices = @transform_7, window_bounds = array<i64: 2, 32, 96>}, {pipeline_mode = #tpu.pipeline_mode<synchronous>, transform_indices = @transform_8, window_bounds = array<i64: 2, 1, 96>}, {pipeline_mode = #tpu.pipeline_mode<synchronous>, transform_indices = @transform_9, window_bounds = array<i64: 2, 32, 32>}, {pipeline_mode = #tpu.pipeline_mode<synchronous>, transform_indices = @transform_10, window_bounds = array<i64: 2, 1, 32>}, {pipeline_mode = #tpu.pipeline_mode<synchronous>, transform_indices = @transform_11, window_bounds = array<i64: 2, 1, 32>}, {pipeline_mode = #tpu.pipeline_mode<synchronous>, transform_indices = @transform_12, window_bounds = array<i64: 2, 1, 32>}, {pipeline_mode = #tpu.pipeline_mode<synchronous>, transform_indices = @transform_13, window_bounds = array<i64: 2, 32, 64>}, {pipeline_mode = #tpu.pipeline_mode<synchronous>, transform_indices = @transform_14, window_bounds = array<i64: 2, 1, 64>}, {pipeline_mode = #tpu.pipeline_mode<synchronous>, transform_indices = @transform_15, window_bounds = array<i64: 2, 64, 32>}, {pipeline_mode = #tpu.pipeline_mode<synchronous>, transform_indices = @transform_16, window_bounds = array<i64: 2, 1, 32>}, {pipeline_mode = #tpu.pipeline_mode<synchronous>, transform_indices = @transform_17, window_bounds = array<i64: 2, 1, 32>}, {pipeline_mode = #tpu.pipeline_mode<synchronous>, transform_indices = @transform_18, window_bounds = array<i64: 2, 1, 32>}, {transform_indices = @transform_19, window_bounds = array<i64: 1, 1, 32>}]} {
    %c0 = arith.constant 0 : index
    %c0_0 = arith.constant 0 : index
    %c0_1 = arith.constant 0 : index
    %0 = vector.load %arg1[%c0, %c0_0, %c0_1] : memref<1x8x1xi32, #tpu.memory_space<vmem>>, vector<1x8x1xi32>
    %1 = vector.shape_cast %0 : vector<1x8x1xi32> to vector<8x1xi32>
    %2 = tpu.iota {dimensions = array<i32: 1>} : vector<8x100xi32>
    %3 = vector.broadcast %1 : vector<8x1xi32> to vector<8x100xi32>
    %4 = arith.cmpi eq, %3, %2 : vector<8x100xi32>
    %5 = arith.extui %4 : vector<8x100xi1> to vector<8x100xi32>
    %6 = arith.sitofp %5 : vector<8x100xi32> to vector<8x100xf32>
    %c0_2 = arith.constant 0 : index
    %c0_3 = arith.constant 0 : index
    %7 = vector.load %arg3[%c0_2, %c0_3] : memref<100x32xf32, #tpu.memory_space<vmem>>, vector<100x32xf32>
    %cst = arith.constant dense<0.000000e+00> : vector<8x32xf32>
    %8 = tpu.matmul %6, %7, %cst {dimension_numbers = #tpu.dot_dimension_numbers<[1], [0], [0], [1], [0, 0, 1, 1], [], []>} : vector<8x100xf32>, vector<100x32xf32>, vector<8x32xf32> -> vector<8x32xf32>
    %c0_4 = arith.constant 0 : index
    %c0_5 = arith.constant 0 : index
    %9 = vector.load %arg4[%c0_4, %c0_5] : memref<8x32xf32, #tpu.memory_space<vmem>>, vector<8x32xf32>
    %10 = arith.addf %8, %9 : vector<8x32xf32>
    %c0_6 = arith.constant 0 : index
    %c0_7 = arith.constant 0 : index
    %11 = vector.load %arg5[%c0_6, %c0_7] : memref<1x32xf32, #tpu.memory_space<vmem>>, vector<1x32xf32>
    %12 = vector.broadcast %11 : vector<1x32xf32> to vector<8x32xf32>
    %13 = arith.addf %10, %12 : vector<8x32xf32>
    %c0_8 = arith.constant 0 : index
    %c0_9 = arith.constant 0 : index
    %14 = vector.load %arg6[%c0_8, %c0_9] : memref<1x32xf32, #tpu.memory_space<vmem>>, vector<1x32xf32>
    %c0_10 = arith.constant 0 : index
    %c0_11 = arith.constant 0 : index
    %15 = vector.load %arg7[%c0_10, %c0_11] : memref<1x32xf32, #tpu.memory_space<vmem>>, vector<1x32xf32>
    %cst_12 = arith.constant dense<0.000000e+00> : vector<8xf32>
    %16 = vector.multi_reduction <add>, %13, %cst_12 [1] : vector<8x32xf32> to vector<8xf32>
    %17 = vector.shape_cast %16 : vector<8xf32> to vector<8x1xf32>
    %cst_13 = arith.constant 3.200000e+01 : f32
    %18 = vector.broadcast %cst_13 : f32 to vector<8x1xf32>
    %19 = arith.divf %17, %18 : vector<8x1xf32>
    %20 = vector.broadcast %19 : vector<8x1xf32> to vector<8x32xf32>
    %21 = arith.subf %13, %20 : vector<8x32xf32>
    %22 = arith.mulf %21, %21 : vector<8x32xf32>
    %cst_14 = arith.constant dense<0.000000e+00> : vector<8xf32>
    %23 = vector.multi_reduction <add>, %22, %cst_14 [1] : vector<8x32xf32> to vector<8xf32>
    %24 = vector.shape_cast %23 : vector<8xf32> to vector<8x1xf32>
    %cst_15 = arith.constant 3.200000e+01 : f32
    %25 = vector.broadcast %cst_15 : f32 to vector<8x1xf32>
    %26 = arith.divf %24, %25 : vector<8x1xf32>
    %cst_16 = arith.constant 9.99999996E-13 : f32
    %27 = vector.broadcast %cst_16 : f32 to vector<8x1xf32>
    %28 = arith.addf %26, %27 : vector<8x1xf32>
    %29 = math.rsqrt %28 : vector<8x1xf32>
    %30 = vector.broadcast %29 : vector<8x1xf32> to vector<8x32xf32>
    %31 = arith.mulf %21, %30 : vector<8x32xf32>
    %32 = vector.broadcast %14 : vector<1x32xf32> to vector<8x32xf32>
    %33 = arith.mulf %31, %32 : vector<8x32xf32>
    %34 = vector.broadcast %15 : vector<1x32xf32> to vector<8x32xf32>
    %35 = arith.addf %33, %34 : vector<8x32xf32>
    %c0_17 = arith.constant 0 : index
    %c0_18 = arith.constant 0 : index
    %c0_19 = arith.constant 0 : index
    %36 = vector.load %arg2[%c0_17, %c0_18, %c0_19] : memref<1x1x8xi32, #tpu.memory_space<vmem>>, vector<1x1x8xi32>
    %37 = vector.shape_cast %36 : vector<1x1x8xi32> to vector<1x8xi32>
    %38 = arith.sitofp %37 : vector<1x8xi32> to vector<1x8xf32>
    %cst_20 = arith.constant 1.000000e+00 : f32
    %39 = vector.broadcast %cst_20 : f32 to vector<1x8xf32>
    %40 = arith.subf %39, %38 : vector<1x8xf32>
    %cst_21 = arith.constant -1.000000e+04 : f32
    %41 = vector.broadcast %cst_21 : f32 to vector<1x8xf32>
    %42 = arith.mulf %40, %41 : vector<1x8xf32>
    %43 = arith.truncf %35 : vector<8x32xf32> to vector<8x32xbf16>
    %c0_22 = arith.constant 0 : index
    %c0_23 = arith.constant 0 : index
    %c0_24 = arith.constant 0 : index
    %44 = vector.load %arg8[%c0_22, %c0_23, %c0_24] : memref<2x32x96xbf16, #tpu.memory_space<vmem>>, vector<1x32x96xbf16>
    %45 = vector.shape_cast %44 : vector<1x32x96xbf16> to vector<32x96xbf16>
    %cst_25 = arith.constant dense<0.000000e+00> : vector<8x96xf32>
    %46 = tpu.matmul %43, %45, %cst_25 {dimension_numbers = #tpu.dot_dimension_numbers<[1], [0], [0], [1], [0, 0, 1, 1], [], []>} : vector<8x32xbf16>, vector<32x96xbf16>, vector<8x96xf32> -> vector<8x96xf32>
    %c0_26 = arith.constant 0 : index
    %c0_27 = arith.constant 0 : index
    %c0_28 = arith.constant 0 : index
    %47 = vector.load %arg9[%c0_26, %c0_27, %c0_28] : memref<2x1x96xf32, #tpu.memory_space<vmem>>, vector<1x1x96xf32>
    %48 = vector.shape_cast %47 : vector<1x1x96xf32> to vector<1x96xf32>
    %49 = vector.broadcast %48 : vector<1x96xf32> to vector<8x96xf32>
    %50 = arith.addf %46, %49 : vector<8x96xf32>
    %51 = vector.extract_strided_slice %50 {offsets = [0, 0], sizes = [8, 32], strides = [1, 1]} : vector<8x96xf32> to vector<8x32xf32>
    %52 = vector.extract_strided_slice %50 {offsets = [0, 32], sizes = [8, 32], strides = [1, 1]} : vector<8x96xf32> to vector<8x32xf32>
    %53 = vector.extract_strided_slice %50 {offsets = [0, 64], sizes = [8, 32], strides = [1, 1]} : vector<8x96xf32> to vector<8x32xf32>
    %54 = vector.extract_strided_slice %51 {offsets = [0, 0], sizes = [8, 16], strides = [1, 1]} : vector<8x32xf32> to vector<8x16xf32>
    %55 = arith.truncf %54 : vector<8x16xf32> to vector<8x16xbf16>
    %56 = vector.extract_strided_slice %52 {offsets = [0, 0], sizes = [8, 16], strides = [1, 1]} : vector<8x32xf32> to vector<8x16xf32>
    %57 = arith.truncf %56 : vector<8x16xf32> to vector<8x16xbf16>
    %cst_29 = arith.constant dense<0.000000e+00> : vector<8x8xf32>
    %58 = tpu.matmul %55, %57, %cst_29 {dimension_numbers = #tpu.dot_dimension_numbers<[1], [1], [0], [0], [0, 0, 1, 0], [], []>} : vector<8x16xbf16>, vector<8x16xbf16>, vector<8x8xf32> -> vector<8x8xf32>
    %cst_30 = arith.constant 2.500000e-01 : f32
    %59 = vector.broadcast %cst_30 : f32 to vector<8x8xf32>
    %60 = arith.mulf %58, %59 : vector<8x8xf32>
    %61 = vector.broadcast %42 : vector<1x8xf32> to vector<8x8xf32>
    %62 = arith.addf %60, %61 : vector<8x8xf32>
    %63 = vector.extract_strided_slice %51 {offsets = [0, 16], sizes = [8, 16], strides = [1, 1]} : vector<8x32xf32> to vector<8x16xf32>
    %64 = arith.truncf %63 : vector<8x16xf32> to vector<8x16xbf16>
    %65 = vector.extract_strided_slice %52 {offsets = [0, 16], sizes = [8, 16], strides = [1, 1]} : vector<8x32xf32> to vector<8x16xf32>
    %66 = arith.truncf %65 : vector<8x16xf32> to vector<8x16xbf16>
    %cst_31 = arith.constant dense<0.000000e+00> : vector<8x8xf32>
    %67 = tpu.matmul %64, %66, %cst_31 {dimension_numbers = #tpu.dot_dimension_numbers<[1], [1], [0], [0], [0, 0, 1, 0], [], []>} : vector<8x16xbf16>, vector<8x16xbf16>, vector<8x8xf32> -> vector<8x8xf32>
    %cst_32 = arith.constant 2.500000e-01 : f32
    %68 = vector.broadcast %cst_32 : f32 to vector<8x8xf32>
    %69 = arith.mulf %67, %68 : vector<8x8xf32>
    %70 = vector.broadcast %42 : vector<1x8xf32> to vector<8x8xf32>
    %71 = arith.addf %69, %70 : vector<8x8xf32>
    %72 = tpu.concatenate %62, %71 in 0 : vector<8x8xf32>, vector<8x8xf32> -> vector<16x8xf32>
    %cst_33 = arith.constant dense<0xFF800000> : vector<16xf32>
    %73 = vector.multi_reduction <maximumf>, %72, %cst_33 [1] : vector<16x8xf32> to vector<16xf32>
    %74 = vector.shape_cast %73 : vector<16xf32> to vector<16x1xf32>
    %75 = vector.broadcast %74 : vector<16x1xf32> to vector<16x8xf32>
    %76 = arith.subf %72, %75 : vector<16x8xf32>
    %77 = math.exp %76 : vector<16x8xf32>
    %cst_34 = arith.constant dense<0.000000e+00> : vector<16xf32>
    %78 = vector.multi_reduction <add>, %77, %cst_34 [1] : vector<16x8xf32> to vector<16xf32>
    %79 = vector.shape_cast %78 : vector<16xf32> to vector<16x1xf32>
    %80 = tpu.reciprocal %79 {approx = true} : vector<16x1xf32> -> vector<16x1xf32>
    %81 = vector.broadcast %80 : vector<16x1xf32> to vector<16x8xf32>
    %82 = arith.mulf %77, %81 : vector<16x8xf32>
    %83 = vector.extract_strided_slice %82 {offsets = [0, 0], sizes = [8, 8], strides = [1, 1]} : vector<16x8xf32> to vector<8x8xf32>
    %84 = arith.truncf %83 : vector<8x8xf32> to vector<8x8xbf16>
    %85 = vector.extract_strided_slice %53 {offsets = [0, 0], sizes = [8, 16], strides = [1, 1]} : vector<8x32xf32> to vector<8x16xf32>
    %86 = arith.truncf %85 : vector<8x16xf32> to vector<8x16xbf16>
    %cst_35 = arith.constant dense<0.000000e+00> : vector<8x16xf32>
    %87 = tpu.matmul %84, %86, %cst_35 {dimension_numbers = #tpu.dot_dimension_numbers<[1], [0], [0], [1], [0, 0, 1, 1], [], []>} : vector<8x8xbf16>, vector<8x16xbf16>, vector<8x16xf32> -> vector<8x16xf32>
    %c0_36 = arith.constant 0 : index
    %c0_37 = arith.constant 0 : index
    %88 = vector.load %arg21[%c0_36, %c0_37] : memref<8x32xf32, #tpu.memory_space<vmem>>, vector<8x16xf32>
    tpu.vector_store %arg21[%c0_36, %c0_37], %87 {strides = array<i32>} : memref<8x32xf32, #tpu.memory_space<vmem>>, vector<8x16xf32>,
    %89 = vector.extract_strided_slice %82 {offsets = [8, 0], sizes = [8, 8], strides = [1, 1]} : vector<16x8xf32> to vector<8x8xf32>
    %90 = arith.truncf %89 : vector<8x8xf32> to vector<8x8xbf16>
    %91 = vector.extract_strided_slice %53 {offsets = [0, 16], sizes = [8, 16], strides = [1, 1]} : vector<8x32xf32> to vector<8x16xf32>
    %92 = arith.truncf %91 : vector<8x16xf32> to vector<8x16xbf16>
    %cst_38 = arith.constant dense<0.000000e+00> : vector<8x16xf32>
    %93 = tpu.matmul %90, %92, %cst_38 {dimension_numbers = #tpu.dot_dimension_numbers<[1], [0], [0], [1], [0, 0, 1, 1], [], []>} : vector<8x8xbf16>, vector<8x16xbf16>, vector<8x16xf32> -> vector<8x16xf32>
    %c0_39 = arith.constant 0 : index
    %c16 = arith.constant 16 : index
    %94 = vector.load %arg21[%c0_39, %c16] : memref<8x32xf32, #tpu.memory_space<vmem>>, vector<8x16xf32>
    tpu.vector_store %arg21[%c0_39, %c16], %93 {strides = array<i32>} : memref<8x32xf32, #tpu.memory_space<vmem>>, vector<8x16xf32>,
    %c0_40 = arith.constant 0 : index
    %c0_41 = arith.constant 0 : index
    %95 = vector.load %arg21[%c0_40, %c0_41] : memref<8x32xf32, #tpu.memory_space<vmem>>, vector<8x32xf32>
    %96 = arith.truncf %95 : vector<8x32xf32> to vector<8x32xbf16>
    %c0_42 = arith.constant 0 : index
    %c0_43 = arith.constant 0 : index
    %c0_44 = arith.constant 0 : index
    %97 = vector.load %arg10[%c0_42, %c0_43, %c0_44] : memref<2x32x32xbf16, #tpu.memory_space<vmem>>, vector<1x32x32xbf16>
    %98 = vector.shape_cast %97 : vector<1x32x32xbf16> to vector<32x32xbf16>
    %cst_45 = arith.constant dense<0.000000e+00> : vector<8x32xf32>
    %99 = tpu.matmul %96, %98, %cst_45 {dimension_numbers = #tpu.dot_dimension_numbers<[1], [0], [0], [1], [0, 0, 1, 1], [], []>} : vector<8x32xbf16>, vector<32x32xbf16>, vector<8x32xf32> -> vector<8x32xf32>
    %c0_46 = arith.constant 0 : index
    %c0_47 = arith.constant 0 : index
    %c0_48 = arith.constant 0 : index
    %100 = vector.load %arg11[%c0_46, %c0_47, %c0_48] : memref<2x1x32xf32, #tpu.memory_space<vmem>>, vector<1x1x32xf32>
    %101 = vector.shape_cast %100 : vector<1x1x32xf32> to vector<1x32xf32>
    %102 = vector.broadcast %101 : vector<1x32xf32> to vector<8x32xf32>
    %103 = arith.addf %99, %102 : vector<8x32xf32>
    %104 = arith.addf %103, %35 : vector<8x32xf32>
    %c0_49 = arith.constant 0 : index
    %c0_50 = arith.constant 0 : index
    %c0_51 = arith.constant 0 : index
    %105 = vector.load %arg12[%c0_49, %c0_50, %c0_51] : memref<2x1x32xf32, #tpu.memory_space<vmem>>, vector<1x1x32xf32>
    %106 = vector.shape_cast %105 : vector<1x1x32xf32> to vector<1x32xf32>
    %c0_52 = arith.constant 0 : index
    %c0_53 = arith.constant 0 : index
    %c0_54 = arith.constant 0 : index
    %107 = vector.load %arg13[%c0_52, %c0_53, %c0_54] : memref<2x1x32xf32, #tpu.memory_space<vmem>>, vector<1x1x32xf32>
    %108 = vector.shape_cast %107 : vector<1x1x32xf32> to vector<1x32xf32>
    %cst_55 = arith.constant dense<0.000000e+00> : vector<8xf32>
    %109 = vector.multi_reduction <add>, %104, %cst_55 [1] : vector<8x32xf32> to vector<8xf32>
    %110 = vector.shape_cast %109 : vector<8xf32> to vector<8x1xf32>
    %cst_56 = arith.constant 3.200000e+01 : f32
    %111 = vector.broadcast %cst_56 : f32 to vector<8x1xf32>
    %112 = arith.divf %110, %111 : vector<8x1xf32>
    %113 = vector.broadcast %112 : vector<8x1xf32> to vector<8x32xf32>
    %114 = arith.subf %104, %113 : vector<8x32xf32>
    %115 = arith.mulf %114, %114 : vector<8x32xf32>
    %cst_57 = arith.constant dense<0.000000e+00> : vector<8xf32>
    %116 = vector.multi_reduction <add>, %115, %cst_57 [1] : vector<8x32xf32> to vector<8xf32>
    %117 = vector.shape_cast %116 : vector<8xf32> to vector<8x1xf32>
    %cst_58 = arith.constant 3.200000e+01 : f32
    %118 = vector.broadcast %cst_58 : f32 to vector<8x1xf32>
    %119 = arith.divf %117, %118 : vector<8x1xf32>
    %cst_59 = arith.constant 9.99999996E-13 : f32
    %120 = vector.broadcast %cst_59 : f32 to vector<8x1xf32>
    %121 = arith.addf %119, %120 : vector<8x1xf32>
    %122 = math.rsqrt %121 : vector<8x1xf32>
    %123 = vector.broadcast %122 : vector<8x1xf32> to vector<8x32xf32>
    %124 = arith.mulf %114, %123 : vector<8x32xf32>
    %125 = vector.broadcast %106 : vector<1x32xf32> to vector<8x32xf32>
    %126 = arith.mulf %124, %125 : vector<8x32xf32>
    %127 = vector.broadcast %108 : vector<1x32xf32> to vector<8x32xf32>
    %128 = arith.addf %126, %127 : vector<8x32xf32>
    %129 = arith.truncf %128 : vector<8x32xf32> to vector<8x32xbf16>
    %c0_60 = arith.constant 0 : index
    %c0_61 = arith.constant 0 : index
    %c0_62 = arith.constant 0 : index
    %130 = vector.load %arg14[%c0_60, %c0_61, %c0_62] : memref<2x32x64xbf16, #tpu.memory_space<vmem>>, vector<1x32x64xbf16>
    %131 = vector.shape_cast %130 : vector<1x32x64xbf16> to vector<32x64xbf16>
    %cst_63 = arith.constant dense<0.000000e+00> : vector<8x64xf32>
    %132 = tpu.matmul %129, %131, %cst_63 {dimension_numbers = #tpu.dot_dimension_numbers<[1], [0], [0], [1], [0, 0, 1, 1], [], []>} : vector<8x32xbf16>, vector<32x64xbf16>, vector<8x64xf32> -> vector<8x64xf32>
    %c0_64 = arith.constant 0 : index
    %c0_65 = arith.constant 0 : index
    %c0_66 = arith.constant 0 : index
    %133 = vector.load %arg15[%c0_64, %c0_65, %c0_66] : memref<2x1x64xf32, #tpu.memory_space<vmem>>, vector<1x1x64xf32>
    %134 = vector.shape_cast %133 : vector<1x1x64xf32> to vector<1x64xf32>
    %135 = vector.broadcast %134 : vector<1x64xf32> to vector<8x64xf32>
    %136 = arith.addf %132, %135 : vector<8x64xf32>
    %137 = arith.mulf %136, %136 : vector<8x64xf32>
    %138 = arith.mulf %136, %137 : vector<8x64xf32>
    %cst_67 = arith.constant 4.471500e-02 : f32
    %139 = vector.broadcast %cst_67 : f32 to vector<8x64xf32>
    %140 = arith.mulf %139, %138 : vector<8x64xf32>
    %141 = arith.addf %136, %140 : vector<8x64xf32>
    %cst_68 = arith.constant 0.797884583 : f32
    %142 = vector.broadcast %cst_68 : f32 to vector<8x64xf32>
    %143 = arith.mulf %142, %141 : vector<8x64xf32>
    %144 = math.tanh %143 : vector<8x64xf32>
    %cst_69 = arith.constant 1.000000e+00 : f32
    %145 = vector.broadcast %cst_69 : f32 to vector<8x64xf32>
    %146 = arith.addf %145, %144 : vector<8x64xf32>
    %cst_70 = arith.constant 5.000000e-01 : f32
    %147 = vector.broadcast %cst_70 : f32 to vector<8x64xf32>
    %148 = arith.mulf %147, %146 : vector<8x64xf32>
    %149 = arith.mulf %136, %148 : vector<8x64xf32>
    %150 = arith.truncf %149 : vector<8x64xf32> to vector<8x64xbf16>
    %c0_71 = arith.constant 0 : index
    %c0_72 = arith.constant 0 : index
    %c0_73 = arith.constant 0 : index
    %151 = vector.load %arg16[%c0_71, %c0_72, %c0_73] : memref<2x64x32xbf16, #tpu.memory_space<vmem>>, vector<1x64x32xbf16>
    %152 = vector.shape_cast %151 : vector<1x64x32xbf16> to vector<64x32xbf16>
    %cst_74 = arith.constant dense<0.000000e+00> : vector<8x32xf32>
    %153 = tpu.matmul %150, %152, %cst_74 {dimension_numbers = #tpu.dot_dimension_numbers<[1], [0], [0], [1], [0, 0, 1, 1], [], []>} : vector<8x64xbf16>, vector<64x32xbf16>, vector<8x32xf32> -> vector<8x32xf32>
    %c0_75 = arith.constant 0 : index
    %c0_76 = arith.constant 0 : index
    %c0_77 = arith.constant 0 : index
    %154 = vector.load %arg17[%c0_75, %c0_76, %c0_77] : memref<2x1x32xf32, #tpu.memory_space<vmem>>, vector<1x1x32xf32>
    %155 = vector.shape_cast %154 : vector<1x1x32xf32> to vector<1x32xf32>
    %156 = vector.broadcast %155 : vector<1x32xf32> to vector<8x32xf32>
    %157 = arith.addf %153, %156 : vector<8x32xf32>
    %158 = arith.addf %157, %128 : vector<8x32xf32>
    %c0_78 = arith.constant 0 : index
    %c0_79 = arith.constant 0 : index
    %c0_80 = arith.constant 0 : index
    %159 = vector.load %arg18[%c0_78, %c0_79, %c0_80] : memref<2x1x32xf32, #tpu.memory_space<vmem>>, vector<1x1x32xf32>
    %160 = vector.shape_cast %159 : vector<1x1x32xf32> to vector<1x32xf32>
    %c0_81 = arith.constant 0 : index
    %c0_82 = arith.constant 0 : index
    %c0_83 = arith.constant 0 : index
    %161 = vector.load %arg19[%c0_81, %c0_82, %c0_83] : memref<2x1x32xf32, #tpu.memory_space<vmem>>, vector<1x1x32xf32>
    %162 = vector.shape_cast %161 : vector<1x1x32xf32> to vector<1x32xf32>
    %cst_84 = arith.constant dense<0.000000e+00> : vector<8xf32>
    %163 = vector.multi_reduction <add>, %158, %cst_84 [1] : vector<8x32xf32> to vector<8xf32>
    %164 = vector.shape_cast %163 : vector<8xf32> to vector<8x1xf32>
    %cst_85 = arith.constant 3.200000e+01 : f32
    %165 = vector.broadcast %cst_85 : f32 to vector<8x1xf32>
    %166 = arith.divf %164, %165 : vector<8x1xf32>
    %167 = vector.broadcast %166 : vector<8x1xf32> to vector<8x32xf32>
    %168 = arith.subf %158, %167 : vector<8x32xf32>
    %169 = arith.mulf %168, %168 : vector<8x32xf32>
    %cst_86 = arith.constant dense<0.000000e+00> : vector<8xf32>
    %170 = vector.multi_reduction <add>, %169, %cst_86 [1] : vector<8x32xf32> to vector<8xf32>
    %171 = vector.shape_cast %170 : vector<8xf32> to vector<8x1xf32>
    %cst_87 = arith.constant 3.200000e+01 : f32
    %172 = vector.broadcast %cst_87 : f32 to vector<8x1xf32>
    %173 = arith.divf %171, %172 : vector<8x1xf32>
    %cst_88 = arith.constant 9.99999996E-13 : f32
    %174 = vector.broadcast %cst_88 : f32 to vector<8x1xf32>
    %175 = arith.addf %173, %174 : vector<8x1xf32>
    %176 = math.rsqrt %175 : vector<8x1xf32>
    %177 = vector.broadcast %176 : vector<8x1xf32> to vector<8x32xf32>
    %178 = arith.mulf %168, %177 : vector<8x32xf32>
    %179 = vector.broadcast %160 : vector<1x32xf32> to vector<8x32xf32>
    %180 = arith.mulf %178, %179 : vector<8x32xf32>
    %181 = vector.broadcast %162 : vector<1x32xf32> to vector<8x32xf32>
    %182 = arith.addf %180, %181 : vector<8x32xf32>
    %183 = arith.truncf %182 : vector<8x32xf32> to vector<8x32xbf16>
    %c1 = arith.constant 1 : index
    %c0_89 = arith.constant 0 : index
    %c0_90 = arith.constant 0 : index
    %184 = vector.load %arg8[%c1, %c0_89, %c0_90] : memref<2x32x96xbf16, #tpu.memory_space<vmem>>, vector<1x32x96xbf16>
    %185 = vector.shape_cast %184 : vector<1x32x96xbf16> to vector<32x96xbf16>
    %cst_91 = arith.constant dense<0.000000e+00> : vector<8x96xf32>
    %186 = tpu.matmul %183, %185, %cst_91 {dimension_numbers = #tpu.dot_dimension_numbers<[1], [0], [0], [1], [0, 0, 1, 1], [], []>} : vector<8x32xbf16>, vector<32x96xbf16>, vector<8x96xf32> -> vector<8x96xf32>
    %c1_92 = arith.constant 1 : index
    %c0_93 = arith.constant 0 : index
    %c0_94 = arith.constant 0 : index
    %187 = vector.load %arg9[%c1_92, %c0_93, %c0_94] : memref<2x1x96xf32, #tpu.memory_space<vmem>>, vector<1x1x96xf32>
    %188 = vector.shape_cast %187 : vector<1x1x96xf32> to vector<1x96xf32>
    %189 = vector.broadcast %188 : vector<1x96xf32> to vector<8x96xf32>
    %190 = arith.addf %186, %189 : vector<8x96xf32>
    %191 = vector.extract_strided_slice %190 {offsets = [0, 0], sizes = [8, 32], strides = [1, 1]} : vector<8x96xf32> to vector<8x32xf32>
    %192 = vector.extract_strided_slice %190 {offsets = [0, 32], sizes = [8, 32], strides = [1, 1]} : vector<8x96xf32> to vector<8x32xf32>
    %193 = vector.extract_strided_slice %190 {offsets = [0, 64], sizes = [8, 32], strides = [1, 1]} : vector<8x96xf32> to vector<8x32xf32>
    %194 = vector.extract_strided_slice %191 {offsets = [0, 0], sizes = [8, 16], strides = [1, 1]} : vector<8x32xf32> to vector<8x16xf32>
    %195 = arith.truncf %194 : vector<8x16xf32> to vector<8x16xbf16>
    %196 = vector.extract_strided_slice %192 {offsets = [0, 0], sizes = [8, 16], strides = [1, 1]} : vector<8x32xf32> to vector<8x16xf32>
    %197 = arith.truncf %196 : vector<8x16xf32> to vector<8x16xbf16>
    %cst_95 = arith.constant dense<0.000000e+00> : vector<8x8xf32>
    %198 = tpu.matmul %195, %197, %cst_95 {dimension_numbers = #tpu.dot_dimension_numbers<[1], [1], [0], [0], [0, 0, 1, 0], [], []>} : vector<8x16xbf16>, vector<8x16xbf16>, vector<8x8xf32> -> vector<8x8xf32>
    %cst_96 = arith.constant 2.500000e-01 : f32
    %199 = vector.broadcast %cst_96 : f32 to vector<8x8xf32>
    %200 = arith.mulf %198, %199 : vector<8x8xf32>
    %201 = vector.broadcast %42 : vector<1x8xf32> to vector<8x8xf32>
    %202 = arith.addf %200, %201 : vector<8x8xf32>
    %203 = vector.extract_strided_slice %191 {offsets = [0, 16], sizes = [8, 16], strides = [1, 1]} : vector<8x32xf32> to vector<8x16xf32>
    %204 = arith.truncf %203 : vector<8x16xf32> to vector<8x16xbf16>
    %205 = vector.extract_strided_slice %192 {offsets = [0, 16], sizes = [8, 16], strides = [1, 1]} : vector<8x32xf32> to vector<8x16xf32>
    %206 = arith.truncf %205 : vector<8x16xf32> to vector<8x16xbf16>
    %cst_97 = arith.constant dense<0.000000e+00> : vector<8x8xf32>
    %207 = tpu.matmul %204, %206, %cst_97 {dimension_numbers = #tpu.dot_dimension_numbers<[1], [1], [0], [0], [0, 0, 1, 0], [], []>} : vector<8x16xbf16>, vector<8x16xbf16>, vector<8x8xf32> -> vector<8x8xf32>
    %cst_98 = arith.constant 2.500000e-01 : f32
    %208 = vector.broadcast %cst_98 : f32 to vector<8x8xf32>
    %209 = arith.mulf %207, %208 : vector<8x8xf32>
    %210 = vector.broadcast %42 : vector<1x8xf32> to vector<8x8xf32>
    %211 = arith.addf %209, %210 : vector<8x8xf32>
    %212 = tpu.concatenate %202, %211 in 0 : vector<8x8xf32>, vector<8x8xf32> -> vector<16x8xf32>
    %cst_99 = arith.constant dense<0xFF800000> : vector<16xf32>
    %213 = vector.multi_reduction <maximumf>, %212, %cst_99 [1] : vector<16x8xf32> to vector<16xf32>
    %214 = vector.shape_cast %213 : vector<16xf32> to vector<16x1xf32>
    %215 = vector.broadcast %214 : vector<16x1xf32> to vector<16x8xf32>
    %216 = arith.subf %212, %215 : vector<16x8xf32>
    %217 = math.exp %216 : vector<16x8xf32>
    %cst_100 = arith.constant dense<0.000000e+00> : vector<16xf32>
    %218 = vector.multi_reduction <add>, %217, %cst_100 [1] : vector<16x8xf32> to vector<16xf32>
    %219 = vector.shape_cast %218 : vector<16xf32> to vector<16x1xf32>
    %220 = tpu.reciprocal %219 {approx = true} : vector<16x1xf32> -> vector<16x1xf32>
    %221 = vector.broadcast %220 : vector<16x1xf32> to vector<16x8xf32>
    %222 = arith.mulf %217, %221 : vector<16x8xf32>
    %223 = vector.extract_strided_slice %222 {offsets = [0, 0], sizes = [8, 8], strides = [1, 1]} : vector<16x8xf32> to vector<8x8xf32>
    %224 = arith.truncf %223 : vector<8x8xf32> to vector<8x8xbf16>
    %225 = vector.extract_strided_slice %193 {offsets = [0, 0], sizes = [8, 16], strides = [1, 1]} : vector<8x32xf32> to vector<8x16xf32>
    %226 = arith.truncf %225 : vector<8x16xf32> to vector<8x16xbf16>
    %cst_101 = arith.constant dense<0.000000e+00> : vector<8x16xf32>
    %227 = tpu.matmul %224, %226, %cst_101 {dimension_numbers = #tpu.dot_dimension_numbers<[1], [0], [0], [1], [0, 0, 1, 1], [], []>} : vector<8x8xbf16>, vector<8x16xbf16>, vector<8x16xf32> -> vector<8x16xf32>
    %c0_102 = arith.constant 0 : index
    %c0_103 = arith.constant 0 : index
    %228 = vector.load %arg21[%c0_102, %c0_103] : memref<8x32xf32, #tpu.memory_space<vmem>>, vector<8x16xf32>
    tpu.vector_store %arg21[%c0_102, %c0_103], %227 {strides = array<i32>} : memref<8x32xf32, #tpu.memory_space<vmem>>, vector<8x16xf32>,
    %229 = vector.extract_strided_slice %222 {offsets = [8, 0], sizes = [8, 8], strides = [1, 1]} : vector<16x8xf32> to vector<8x8xf32>
    %230 = arith.truncf %229 : vector<8x8xf32> to vector<8x8xbf16>
    %231 = vector.extract_strided_slice %193 {offsets = [0, 16], sizes = [8, 16], strides = [1, 1]} : vector<8x32xf32> to vector<8x16xf32>
    %232 = arith.truncf %231 : vector<8x16xf32> to vector<8x16xbf16>
    %cst_104 = arith.constant dense<0.000000e+00> : vector<8x16xf32>
    %233 = tpu.matmul %230, %232, %cst_104 {dimension_numbers = #tpu.dot_dimension_numbers<[1], [0], [0], [1], [0, 0, 1, 1], [], []>} : vector<8x8xbf16>, vector<8x16xbf16>, vector<8x16xf32> -> vector<8x16xf32>
    %c0_105 = arith.constant 0 : index
    %c16_106 = arith.constant 16 : index
    %234 = vector.load %arg21[%c0_105, %c16_106] : memref<8x32xf32, #tpu.memory_space<vmem>>, vector<8x16xf32>
    tpu.vector_store %arg21[%c0_105, %c16_106], %233 {strides = array<i32>} : memref<8x32xf32, #tpu.memory_space<vmem>>, vector<8x16xf32>,
    %c0_107 = arith.constant 0 : index
    %c0_108 = arith.constant 0 : index
    %235 = vector.load %arg21[%c0_107, %c0_108] : memref<8x32xf32, #tpu.memory_space<vmem>>, vector<8x32xf32>
    %236 = arith.truncf %235 : vector<8x32xf32> to vector<8x32xbf16>
    %c1_109 = arith.constant 1 : index
    %c0_110 = arith.constant 0 : index
    %c0_111 = arith.constant 0 : index
    %237 = vector.load %arg10[%c1_109, %c0_110, %c0_111] : memref<2x32x32xbf16, #tpu.memory_space<vmem>>, vector<1x32x32xbf16>
    %238 = vector.shape_cast %237 : vector<1x32x32xbf16> to vector<32x32xbf16>
    %cst_112 = arith.constant dense<0.000000e+00> : vector<8x32xf32>
    %239 = tpu.matmul %236, %238, %cst_112 {dimension_numbers = #tpu.dot_dimension_numbers<[1], [0], [0], [1], [0, 0, 1, 1], [], []>} : vector<8x32xbf16>, vector<32x32xbf16>, vector<8x32xf32> -> vector<8x32xf32>
    %c1_113 = arith.constant 1 : index
    %c0_114 = arith.constant 0 : index
    %c0_115 = arith.constant 0 : index
    %240 = vector.load %arg11[%c1_113, %c0_114, %c0_115] : memref<2x1x32xf32, #tpu.memory_space<vmem>>, vector<1x1x32xf32>
    %241 = vector.shape_cast %240 : vector<1x1x32xf32> to vector<1x32xf32>
    %242 = vector.broadcast %241 : vector<1x32xf32> to vector<8x32xf32>
    %243 = arith.addf %239, %242 : vector<8x32xf32>
    %244 = arith.addf %243, %182 : vector<8x32xf32>
    %c1_116 = arith.constant 1 : index
    %c0_117 = arith.constant 0 : index
    %c0_118 = arith.constant 0 : index
    %245 = vector.load %arg12[%c1_116, %c0_117, %c0_118] : memref<2x1x32xf32, #tpu.memory_space<vmem>>, vector<1x1x32xf32>
    %246 = vector.shape_cast %245 : vector<1x1x32xf32> to vector<1x32xf32>
    %c1_119 = arith.constant 1 : index
    %c0_120 = arith.constant 0 : index
    %c0_121 = arith.constant 0 : index
    %247 = vector.load %arg13[%c1_119, %c0_120, %c0_121] : memref<2x1x32xf32, #tpu.memory_space<vmem>>, vector<1x1x32xf32>
    %248 = vector.shape_cast %247 : vector<1x1x32xf32> to vector<1x32xf32>
    %cst_122 = arith.constant dense<0.000000e+00> : vector<8xf32>
    %249 = vector.multi_reduction <add>, %244, %cst_122 [1] : vector<8x32xf32> to vector<8xf32>
    %250 = vector.shape_cast %249 : vector<8xf32> to vector<8x1xf32>
    %cst_123 = arith.constant 3.200000e+01 : f32
    %251 = vector.broadcast %cst_123 : f32 to vector<8x1xf32>
    %252 = arith.divf %250, %251 : vector<8x1xf32>
    %253 = vector.broadcast %252 : vector<8x1xf32> to vector<8x32xf32>
    %254 = arith.subf %244, %253 : vector<8x32xf32>
    %255 = arith.mulf %254, %254 : vector<8x32xf32>
    %cst_124 = arith.constant dense<0.000000e+00> : vector<8xf32>
    %256 = vector.multi_reduction <add>, %255, %cst_124 [1] : vector<8x32xf32> to vector<8xf32>
    %257 = vector.shape_cast %256 : vector<8xf32> to vector<8x1xf32>
    %cst_125 = arith.constant 3.200000e+01 : f32
    %258 = vector.broadcast %cst_125 : f32 to vector<8x1xf32>
    %259 = arith.divf %257, %258 : vector<8x1xf32>
    %cst_126 = arith.constant 9.99999996E-13 : f32
    %260 = vector.broadcast %cst_126 : f32 to vector<8x1xf32>
    %261 = arith.addf %259, %260 : vector<8x1xf32>
    %262 = math.rsqrt %261 : vector<8x1xf32>
    %263 = vector.broadcast %262 : vector<8x1xf32> to vector<8x32xf32>
    %264 = arith.mulf %254, %263 : vector<8x32xf32>
    %265 = vector.broadcast %246 : vector<1x32xf32> to vector<8x32xf32>
    %266 = arith.mulf %264, %265 : vector<8x32xf32>
    %267 = vector.broadcast %248 : vector<1x32xf32> to vector<8x32xf32>
    %268 = arith.addf %266, %267 : vector<8x32xf32>
    %269 = arith.truncf %268 : vector<8x32xf32> to vector<8x32xbf16>
    %c1_127 = arith.constant 1 : index
    %c0_128 = arith.constant 0 : index
    %c0_129 = arith.constant 0 : index
    %270 = vector.load %arg14[%c1_127, %c0_128, %c0_129] : memref<2x32x64xbf16, #tpu.memory_space<vmem>>, vector<1x32x64xbf16>
    %271 = vector.shape_cast %270 : vector<1x32x64xbf16> to vector<32x64xbf16>
    %cst_130 = arith.constant dense<0.000000e+00> : vector<8x64xf32>
    %272 = tpu.matmul %269, %271, %cst_130 {dimension_numbers = #tpu.dot_dimension_numbers<[1], [0], [0], [1], [0, 0, 1, 1], [], []>} : vector<8x32xbf16>, vector<32x64xbf16>, vector<8x64xf32> -> vector<8x64xf32>
    %c1_131 = arith.constant 1 : index
    %c0_132 = arith.constant 0 : index
    %c0_133 = arith.constant 0 : index
    %273 = vector.load %arg15[%c1_131, %c0_132, %c0_133] : memref<2x1x64xf32, #tpu.memory_space<vmem>>, vector<1x1x64xf32>
    %274 = vector.shape_cast %273 : vector<1x1x64xf32> to vector<1x64xf32>
    %275 = vector.broadcast %274 : vector<1x64xf32> to vector<8x64xf32>
    %276 = arith.addf %272, %275 : vector<8x64xf32>
    %277 = arith.mulf %276, %276 : vector<8x64xf32>
    %278 = arith.mulf %276, %277 : vector<8x64xf32>
    %cst_134 = arith.constant 4.471500e-02 : f32
    %279 = vector.broadcast %cst_134 : f32 to vector<8x64xf32>
    %280 = arith.mulf %279, %278 : vector<8x64xf32>
    %281 = arith.addf %276, %280 : vector<8x64xf32>
    %cst_135 = arith.constant 0.797884583 : f32
    %282 = vector.broadcast %cst_135 : f32 to vector<8x64xf32>
    %283 = arith.mulf %282, %281 : vector<8x64xf32>
    %284 = math.tanh %283 : vector<8x64xf32>
    %cst_136 = arith.constant 1.000000e+00 : f32
    %285 = vector.broadcast %cst_136 : f32 to vector<8x64xf32>
    %286 = arith.addf %285, %284 : vector<8x64xf32>
    %cst_137 = arith.constant 5.000000e-01 : f32
    %287 = vector.broadcast %cst_137 : f32 to vector<8x64xf32>
    %288 = arith.mulf %287, %286 : vector<8x64xf32>
    %289 = arith.mulf %276, %288 : vector<8x64xf32>
    %290 = arith.truncf %289 : vector<8x64xf32> to vector<8x64xbf16>
    %c1_138 = arith.constant 1 : index
    %c0_139 = arith.constant 0 : index
    %c0_140 = arith.constant 0 : index
    %291 = vector.load %arg16[%c1_138, %c0_139, %c0_140] : memref<2x64x32xbf16, #tpu.memory_space<vmem>>, vector<1x64x32xbf16>
    %292 = vector.shape_cast %291 : vector<1x64x32xbf16> to vector<64x32xbf16>
    %cst_141 = arith.constant dense<0.000000e+00> : vector<8x32xf32>
    %293 = tpu.matmul %290, %292, %cst_141 {dimension_numbers = #tpu.dot_dimension_numbers<[1], [0], [0], [1], [0, 0, 1, 1], [], []>} : vector<8x64xbf16>, vector<64x32xbf16>, vector<8x32xf32> -> vector<8x32xf32>
    %c1_142 = arith.constant 1 : index
    %c0_143 = arith.constant 0 : index
    %c0_144 = arith.constant 0 : index
    %294 = vector.load %arg17[%c1_142, %c0_143, %c0_144] : memref<2x1x32xf32, #tpu.memory_space<vmem>>, vector<1x1x32xf32>
    %295 = vector.shape_cast %294 : vector<1x1x32xf32> to vector<1x32xf32>
    %296 = vector.broadcast %295 : vector<1x32xf32> to vector<8x32xf32>
    %297 = arith.addf %293, %296 : vector<8x32xf32>
    %298 = arith.addf %297, %268 : vector<8x32xf32>
    %c1_145 = arith.constant 1 : index
    %c0_146 = arith.constant 0 : index
    %c0_147 = arith.constant 0 : index
    %299 = vector.load %arg18[%c1_145, %c0_146, %c0_147] : memref<2x1x32xf32, #tpu.memory_space<vmem>>, vector<1x1x32xf32>
    %300 = vector.shape_cast %299 : vector<1x1x32xf32> to vector<1x32xf32>
    %c1_148 = arith.constant 1 : index
    %c0_149 = arith.constant 0 : index
    %c0_150 = arith.constant 0 : index
    %301 = vector.load %arg19[%c1_148, %c0_149, %c0_150] : memref<2x1x32xf32, #tpu.memory_space<vmem>>, vector<1x1x32xf32>
    %302 = vector.shape_cast %301 : vector<1x1x32xf32> to vector<1x32xf32>
    %cst_151 = arith.constant dense<0.000000e+00> : vector<8xf32>
    %303 = vector.multi_reduction <add>, %298, %cst_151 [1] : vector<8x32xf32> to vector<8xf32>
    %304 = vector.shape_cast %303 : vector<8xf32> to vector<8x1xf32>
    %cst_152 = arith.constant 3.200000e+01 : f32
    %305 = vector.broadcast %cst_152 : f32 to vector<8x1xf32>
    %306 = arith.divf %304, %305 : vector<8x1xf32>
    %307 = vector.broadcast %306 : vector<8x1xf32> to vector<8x32xf32>
    %308 = arith.subf %298, %307 : vector<8x32xf32>
    %309 = arith.mulf %308, %308 : vector<8x32xf32>
    %cst_153 = arith.constant dense<0.000000e+00> : vector<8xf32>
    %310 = vector.multi_reduction <add>, %309, %cst_153 [1] : vector<8x32xf32> to vector<8xf32>
    %311 = vector.shape_cast %310 : vector<8xf32> to vector<8x1xf32>
    %cst_154 = arith.constant 3.200000e+01 : f32
    %312 = vector.broadcast %cst_154 : f32 to vector<8x1xf32>
    %313 = arith.divf %311, %312 : vector<8x1xf32>
    %cst_155 = arith.constant 9.99999996E-13 : f32
    %314 = vector.broadcast %cst_155 : f32 to vector<8x1xf32>
    %315 = arith.addf %313, %314 : vector<8x1xf32>
    %316 = math.rsqrt %315 : vector<8x1xf32>
    %317 = vector.broadcast %316 : vector<8x1xf32> to vector<8x32xf32>
    %318 = arith.mulf %308, %317 : vector<8x32xf32>
    %319 = vector.broadcast %300 : vector<1x32xf32> to vector<8x32xf32>
    %320 = arith.mulf %318, %319 : vector<8x32xf32>
    %321 = vector.broadcast %302 : vector<1x32xf32> to vector<8x32xf32>
    %322 = arith.addf %320, %321 : vector<8x32xf32>
    %323 = vector.extract_strided_slice %322 {offsets = [0, 0], sizes = [1, 32], strides = [1, 1]} : vector<8x32xf32> to vector<1x32xf32>
    %c0_156 = arith.constant 0 : index
    %c0_157 = arith.constant 0 : index
    %c0_158 = arith.constant 0 : index
    %324 = vector.load %arg20[%c0_156, %c0_157, %c0_158] : memref<1x1x32xf32, #tpu.memory_space<vmem>>, vector<1x1x32xf32>
    %325 = vector.shape_cast %324 : vector<1x1x32xf32> to vector<1x32xf32>
    %326 = vector.shape_cast %323 : vector<1x32xf32> to vector<1x1x32xf32>
    tpu.vector_store %arg20[%c0_156, %c0_157, %c0_158], %326 {strides = array<i32>} : memref<1x1x32xf32, #tpu.memory_space<vmem>>, vector<1x1x32xf32>,
    return
  }
  func.func @transform_0(%arg0: i32) -> (i32, i32, i32) {
    %c0_i32 = arith.constant 0 : i32
    %c0_i32_0 = arith.constant 0 : i32
    %c0_i32_1 = arith.constant 0 : i32
    return %arg0, %c0_i32, %c0_i32_0 : i32, i32, i32
  }
  func.func @transform_1(%arg0: i32) -> (i32, i32, i32) {
    %c0_i32 = arith.constant 0 : i32
    %c0_i32_0 = arith.constant 0 : i32
    %c0_i32_1 = arith.constant 0 : i32
    return %arg0, %c0_i32, %c0_i32_0 : i32, i32, i32
  }
  func.func @transform_2(%arg0: i32) -> (i32, i32) {
    %c0_i32 = arith.constant 0 : i32
    %c0_i32_0 = arith.constant 0 : i32
    %c0_i32_1 = arith.constant 0 : i32
    return %c0_i32, %c0_i32_0 : i32, i32
  }
  func.func @transform_3(%arg0: i32) -> (i32, i32) {
    %c0_i32 = arith.constant 0 : i32
    %c0_i32_0 = arith.constant 0 : i32
    %c0_i32_1 = arith.constant 0 : i32
    return %c0_i32, %c0_i32_0 : i32, i32
  }
  func.func @transform_4(%arg0: i32) -> (i32, i32) {
    %c0_i32 = arith.constant 0 : i32
    %c0_i32_0 = arith.constant 0 : i32
    %c0_i32_1 = arith.constant 0 : i32
    return %c0_i32, %c0_i32_0 : i32, i32
  }
  func.func @transform_5(%arg0: i32) -> (i32, i32) {
    %c0_i32 = arith.constant 0 : i32
    %c0_i32_0 = arith.constant 0 : i32
    %c0_i32_1 = arith.constant 0 : i32
    return %c0_i32, %c0_i32_0 : i32, i32
  }
  func.func @transform_6(%arg0: i32) -> (i32, i32) {
    %c0_i32 = arith.constant 0 : i32
    %c0_i32_0 = arith.constant 0 : i32
    %c0_i32_1 = arith.constant 0 : i32
    return %c0_i32, %c0_i32_0 : i32, i32
  }
  func.func @transform_7(%arg0: i32) -> (i32, i32, i32) {
    %c0_i32 = arith.constant 0 : i32
    %c0_i32_0 = arith.constant 0 : i32
    %c0_i32_1 = arith.constant 0 : i32
    %c0_i32_2 = arith.constant 0 : i32
    return %c0_i32, %c0_i32_0, %c0_i32_1 : i32, i32, i32
  }
  func.func @transform_8(%arg0: i32) -> (i32, i32, i32) {
    %c0_i32 = arith.constant 0 : i32
    %c0_i32_0 = arith.constant 0 : i32
    %c0_i32_1 = arith.constant 0 : i32
    %c0_i32_2 = arith.constant 0 : i32
    return %c0_i32, %c0_i32_0, %c0_i32_1 : i32, i32, i32
  }
  func.func @transform_9(%arg0: i32) -> (i32, i32, i32) {
    %c0_i32 = arith.constant 0 : i32
    %c0_i32_0 = arith.constant 0 : i32
    %c0_i32_1 = arith.constant 0 : i32
    %c0_i32_2 = arith.constant 0 : i32
    return %c0_i32, %c0_i32_0, %c0_i32_1 : i32, i32, i32
  }
  func.func @transform_10(%arg0: i32) -> (i32, i32, i32) {
    %c0_i32 = arith.constant 0 : i32
    %c0_i32_0 = arith.constant 0 : i32
    %c0_i32_1 = arith.constant 0 : i32
    %c0_i32_2 = arith.constant 0 : i32
    return %c0_i32, %c0_i32_0, %c0_i32_1 : i32, i32, i32
  }
  func.func @transform_11(%arg0: i32) -> (i32, i32, i32) {
    %c0_i32 = arith.constant 0 : i32
    %c0_i32_0 = arith.constant 0 : i32
    %c0_i32_1 = arith.constant 0 : i32
    %c0_i32_2 = arith.constant 0 : i32
    return %c0_i32, %c0_i32_0, %c0_i32_1 : i32, i32, i32
  }
  func.func @transform_12(%arg0: i32) -> (i32, i32, i32) {
    %c0_i32 = arith.constant 0 : i32
    %c0_i32_0 = arith.constant 0 : i32
    %c0_i32_1 = arith.constant 0 : i32
    %c0_i32_2 = arith.constant 0 : i32
    return %c0_i32, %c0_i32_0, %c0_i32_1 : i32, i32, i32
  }
  func.func @transform_13(%arg0: i32) -> (i32, i32, i32) {
    %c0_i32 = arith.constant 0 : i32
    %c0_i32_0 = arith.constant 0 : i32
    %c0_i32_1 = arith.constant 0 : i32
    %c0_i32_2 = arith.constant 0 : i32
    return %c0_i32, %c0_i32_0, %c0_i32_1 : i32, i32, i32
  }
  func.func @transform_14(%arg0: i32) -> (i32, i32, i32) {
    %c0_i32 = arith.constant 0 : i32
    %c0_i32_0 = arith.constant 0 : i32
    %c0_i32_1 = arith.constant 0 : i32
    %c0_i32_2 = arith.constant 0 : i32
    return %c0_i32, %c0_i32_0, %c0_i32_1 : i32, i32, i32
  }
  func.func @transform_15(%arg0: i32) -> (i32, i32, i32) {
    %c0_i32 = arith.constant 0 : i32
    %c0_i32_0 = arith.constant 0 : i32
    %c0_i32_1 = arith.constant 0 : i32
    %c0_i32_2 = arith.constant 0 : i32
    return %c0_i32, %c0_i32_0, %c0_i32_1 : i32, i32, i32
  }
  func.func @transform_16(%arg0: i32) -> (i32, i32, i32) {
    %c0_i32 = arith.constant 0 : i32
    %c0_i32_0 = arith.constant 0 : i32
    %c0_i32_1 = arith.constant 0 : i32
    %c0_i32_2 = arith.constant 0 : i32
    return %c0_i32, %c0_i32_0, %c0_i32_1 : i32, i32, i32
  }
  func.func @transform_17(%arg0: i32) -> (i32, i32, i32) {
    %c0_i32 = arith.constant 0 : i32
    %c0_i32_0 = arith.constant 0 : i32
    %c0_i32_1 = arith.constant 0 : i32
    %c0_i32_2 = arith.constant 0 : i32
    return %c0_i32, %c0_i32_0, %c0_i32_1 : i32, i32, i32
  }
  func.func @transform_18(%arg0: i32) -> (i32, i32, i32) {
    %c0_i32 = arith.constant 0 : i32
    %c0_i32_0 = arith.constant 0 : i32
    %c0_i32_1 = arith.constant 0 : i32
    %c0_i32_2 = arith.constant 0 : i32
    return %c0_i32, %c0_i32_0, %c0_i32_1 : i32, i32, i32
  }
  func.func @transform_19(%arg0: i32) -> (i32, i32, i32) {
    %c0_i32 = arith.constant 0 : i32
    %c0_i32_0 = arith.constant 0 : i32
    %c0_i32_1 = arith.constant 0 : i32
    return %arg0, %c0_i32, %c0_i32_0 : i32, i32, i32
  }
}

</mosaic_0001>

<bundles_post_ra>
// kernel: siamese_forward.1
= control target key start
LH: loop header
LB: loop body
LE: loop exit
PB: predicated region body
PF: predicated region fallthrough
CT: control target
= control target key end

     0   :  { %s2997_s0 = inlined_call_operand.vmem [shape: s32[2,8,1], index: 0, kind: input, shape index: {}]   ;;  %s2998_s1 = inlined_call_operand.vmem [shape: s32[2,1,8], index: 1, kind: input, shape index: {}]   ;;  %s2999_s2 = inlined_call_operand.vmem [shape: f32[100,32], index: 2, kind: input, shape index: {}]   ;;  %s3000_s3 = inlined_call_operand.vmem [shape: f32[8,32], index: 3, kind: input, shape index: {}]   ;;  %s3001_s4 = inlined_call_operand.vmem [shape: f32[1,32], index: 4, kind: input, shape index: {}]   ;;  %s3002_s5 = inlined_call_operand.vmem [shape: f32[1,32], index: 5, kind: input, shape index: {}]   ;;  %s3003_s6 = inlined_call_operand.vmem [shape: f32[1,32], index: 6, kind: input, shape index: {}]   ;;  %s3004_s7 = inlined_call_operand.vmem [shape: bf16[2,32,96], index: 7, kind: input, shape index: {}]   ;;  %s3005_s8 = inlined_call_operand.vmem [shape: f32[2,1,96], index: 8, kind: input, shape index: {}]   ;;  %s3006_s9 = inlined_call_operand.vmem [shape: bf16[2,32,32], index: 9, kind: input, shape index: {}]   ;;  %s3007_s10 = inlined_call_operand.vmem [shape: f32[2,1,32], index: 10, kind: input, shape index: {}]   ;;  %s3008_s11 = inlined_call_operand.vmem [shape: f32[2,1,32], index: 11, kind: input, shape index: {}]   ;;  %s3009_s12 = inlined_call_operand.vmem [shape: f32[2,1,32], index: 12, kind: input, shape index: {}]   ;;  %s3010_s13 = inlined_call_operand.vmem [shape: bf16[2,32,64], index: 13, kind: input, shape index: {}]   ;;  %s3011_s14 = inlined_call_operand.vmem [shape: f32[2,1,64], index: 14, kind: input, shape index: {}]   ;;  %s3012_s15 = inlined_call_operand.vmem [shape: bf16[2,64,32], index: 15, kind: input, shape index: {}]   ;;  %s3013_s16 = inlined_call_operand.vmem [shape: f32[2,1,32], index: 16, kind: input, shape index: {}]   ;;  %s3014_s17 = inlined_call_operand.vmem [shape: f32[2,1,32], index: 17, kind: input, shape index: {}]   ;;  %s3015_s18 = inlined_call_operand.vmem [shape: f32[2,1,32], index: 18, kind: input, shape index: {}]   ;;  %s3016_s19 = inlined_call_operand.hbm [shape: f32[2,1,32], index: 19, kind: output, shape index: {}]  }
   0x1   :  { %3027 = sst [smem:[#allocation13_spill]] %s2997_s0 }
   0x2   :  { %3028 = sst [smem:[#allocation14_spill]] %s2998_s1 }
   0x3   :  { %3029 = sst [smem:[#allocation15_spill]] %s2999_s2 }
   0x4   :  { %3030 = sst [smem:[#allocation16_spill]] %s3000_s3 }
   0x5   :  { %3031 = sst [smem:[#allocation17_spill]] %s3001_s4 }
   0x6   :  { %3032 = sst [smem:[#allocation18_spill]] %s3002_s5 }
   0x7   :  { %3033 = sst [smem:[#allocation19_spill]] %s3016_s19 }
   0x8   :  { %24 = vsyncpa [#allocation4], 0 }
   0x9   :  { %26 = vsyncpa [#allocation4 + $0x1], 0  ;;  %s2597_s0 = smov 0   ;;  %s2599_s30 = smov 0  }
   0xa   :  { %s2601_s20 = smov 0   ;;  %s2603_s21 = smov 0  }
   0xb LB: > { %3034 = sst [smem:[#allocation6_spill]] %s2473_s0  ;;  %s2618_s1 = sadd.s32 4294967295, %s2485_s21   ;;  %s2485_s21 = sphi %s2603_s21, %s3055_s21   ;;  %s2481_s20 = sphi %s2601_s20, %s3057_s20   ;;  %s2477_s30 = sphi %s2599_s30, %s3059_s30   ;;  %s2473_s0 = sphi %s2597_s0, %s3058_s0  }
   0xc   : > { %3035 = sst [smem:[#allocation7_spill]] %s2481_s20  ;;  %s2025_s22 = sadd.s32 4294967294, %s2485_s21  }
   0xd   : > { %3036 = sst [smem:[#allocation8_spill]] %s2485_s21  ;;  %s2622_s2 = sadd.s32 1, %s2485_s21  }
   0xe   : > { %3037 = sst [smem:[#allocation9_spill]] %s2622_s2  ;;  %s448_s23 = sadd.s32 1, %s2481_s20 }
   0xf   : > { %s445_s24 = ssub.s32 %s2485_s21, %s2622_s2  ;;  %p458_p0 = scmp.ne.s32.totalorder %s2481_s20, %s2477_s30 }
  0x10   : > { %p446_p1 = scmp.eq.s32.totalorder %s445_s24, 0  ;;  %p459_p2 = scmp.eq.s32.totalorder %s2618_s1, 1 }
  0x11   : > { %p464_p3 = scmp.ne.s32.totalorder %s2477_s30, %s2473_s0  ;;  %p465_p4 = scmp.eq.s32.totalorder %s2025_s22, 1 }
  0x12   : > { %s2633_s25 = scalar_select %p446_p1, %s2481_s20, %s448_s23  }
  0x13   : > { %p2635_p5 = por %p459_p2, %p458_p0  ;;  %p2639_p6 = por %p465_p4, %p464_p3 }
  0x14   : > { %3038 = sst [smem:[#allocation10_spill]] %s2633_s25  ;;  %p2028_p7 = scmp.ge.s32.totalorder %s2485_s21, 1 }
  0x15   : > { %s3039_s3 = scalar_select %p2635_p5, 1, 0 }
  0x16   : > { %s3041_s26 = scalar_select %p2639_p6, 1, 0 }
  0x17   : > { %3040 = sst [smem:[#allocation11_spill]] %s3039_s3  ;;  %p547_p8 = scmp.lt.s32.totalorder %s2485_s21, 3 }
  0x18   : > { %3042 = sst [smem:[#allocation12_spill]] %s3041_s26 }
  0x19   : > { %p548_p9 = pnand %p2028_p7, %p547_p8 }
  0x1a   : > { %p604_p10 = scmp.lt.s32.totalorder (!%p548_p9), %s2618_s1, 1  ;;  %s3043_s29 = sld [smem:[#allocation15_spill]] (!%p548_p9) }
  0x1b   : > { %551 = sbr.rel (%p548_p9) target bundleno = 5470 (0x155e), region = 96  ;;  %s3044_s26 = sld [smem:[#allocation14_spill]] (!%p548_p9) }
  0x1c   : > { %s3045_s3 = sld [smem:[#allocation13_spill]] (!%p548_p9)  ;;  %s2493_s22 = smov (!%p548_p9), 48  }
  0x1d   : > { %s3047_s4 = sld [smem:[#allocation17_spill]] (!%p548_p9)  ;;  %s2494_s23 = smov (!%p548_p9), 64  }
  0x1e   : > { %s3048_s5 = sld [smem:[#allocation18_spill]] (!%p548_p9)  ;;  %s2116_s28 = sshll.u32 (!%p548_p9), %s2618_s1, 4 }
  0x1f   : > { %s3050_s21 = sld [smem:[#allocation19_spill]] (!%p548_p9) }
  0x20   : > { %v633_v0 = vld [vmem:[%s3043_s29 + $0x60] sm:$0xf]  ;;  %vm639_vm0 = vcmask 1043456   ;;  %v2487_v1 = vmov 0   ;;  %v2488_v2 = vmov 0.0   ;;  %v632_v3 = vld [vmem:[%s3043_s29 + $0x58] sm:$0xff]  ;;  %v613_v4 = vlaneseq }
  0x21   : > { %2374 = vset.pattern.permute.xlu0 %v2487_v1  ;;  %2177 = vmatprep.subr.mxu0 %v2488_v2  ;;  %s605_s24 = scalar_select %p604_p10, %s2618_s1, 1  ;;  %v631_v5 = vld [vmem:[%s3043_s29 + $0x50] sm:$0xff]  ;;  %v630_v6 = vld [vmem:[%s3043_s29 + $0x48] sm:$0xff]  ;;  %vm2489_vm1 = vmmov 0   ;;  %v629_v9 = vld [vmem:[%s3043_s29 + $0x40] sm:$0xff]  ;;  %vm635_vm2 = vcmask 818176  }
  0x22   : > { %2178 = vmatpush3.msk.msra.mxu0 %vm639_vm0, %v633_v0  ;;  %2206 = vmatprep.subr.bf16.mxu1 %v2488_v2  ;;  %v877_v7 = vshrl.u32 %v613_v4, 7  ;;  %v628_v12 = vld [vmem:[%s3043_s29 + $0x38] sm:$0xff]  ;;  %v627_v16 = vld [vmem:[%s3043_s29 + $0x30] sm:$0xff]  ;;  %v626_v17 = vld [vmem:[%s3043_s29 + $0x28] sm:$0xff]  ;;  %v614_v24 = vand.u32 127, %v613_v4  ;;  %vm723_vm4 = vcmask 261120  }
  0x23   : > { %2179 = vmatprep.subr.mxu0 %v2488_v2  ;;  %s2029_s25 = sshll.u32 %s605_s24, 3  ;;  %s610_s0 = scalar_lea.vmem %s3044_s26, %s605_s24  ;;  %2203 = vmatprep.mubr.msk.f32.mxu0 %vm2489_vm1, %v2488_v2  ;;  %v625_v19 = vld [vmem:[%s3043_s29 + $0x20] sm:$0xff]  ;;  %v624_v20 = vld [vmem:[%s3043_s29 + $0x18] sm:$0xff]  ;;  %v623_v21 = vld [vmem:[%s3043_s29 + $0x10] sm:$0xff]  ;;  %vm827_vm5 = vcmask 130048   ;;  %vm934_vm6 = vcmask 64512  }
  0x24   : > { %2180 = vmatpush3.msra.mxu0 %v632_v3  ;;  %s607_s27 = scalar_lea.vmem %s3045_s3, %s2029_s25  ;;  %v752_v8 = vld [vmem:[%s610_s0] sm:$0x1]  ;;  %2210 = vmatprep.mubr.msk.bf16.mxu1 %vm2489_vm1, %v2488_v2  ;;  %v878_v14 = vsub.s32 0, %v877_v7  ;;  %v622_v22 = vld [vmem:[%s3043_s29 + $0x8] sm:$0xff]  ;;  %s3046_s25 = sld [smem:[#allocation16_spill]]  ;;  %vm1060_vm7 = vcmask 261248  }
  0x25   : > { %2181 = vmatprep.subr.mxu0 %v2488_v2  ;;  %v612_v10 = vld [vmem:[%s607_s27] sm:$0xff]  ;;  %v753_v11 = vcvt.s32.f32 %v752_v8  ;;  %v2375_v39 = vld [vmem:[%s3004_s7 + $0x8] sm:$0xff]   ;;  %s2491_s3 = smov 80   ;;  %s2492_s24 = smov 112   ;;  %vm1276_vm8 = vcmask 523264   ;;  %vm1946_vm9 = vcmask 253952  }
  0x26   : > { %2182 = vmatpush3.msra.mxu0 %v631_v5  ;;  %616 = vperm.xlu0 %2374, %v612_v10   ;;  %v621_v23 = vld [vmem:[%s3043_s29] sm:$0xff]  ;;  %s2495_s26 = smov 16   ;;  %s3051_s27 = smov %s3050_s21 }
  0x27   : > { %2183 = vmatprep.subr.mxu0 %v2488_v2  ;;  %v754_v13 = vsub.f32 1.0, %v753_v11  ;;  %v2033_v29 = vld [vmem:[%s3047_s4] ss:$0 sm:$0xff]  ;;  %2207 = vmatpush3.bf16.msra.mxu1 %v2375_v39  ;;  %s1959_s4 = scalar_lea.hbm %s3050_s21, %s2116_s28 }
  0x28   : > { %2184 = vmatpush3.msra.mxu0 %v630_v6  ;;  %v2376_v40 = vld [vmem:[%s3004_s7] sm:$0xff]   ;;  %2208 = vmatprep.subr.bf16.mxu1 %v2488_v2 }
  0x29   : > { %2185 = vmatprep.subr.mxu0 %v2488_v2  ;;  %v755_v15 = vmul.f32 -10000.0, %v754_v13  ;;  %v2034_v45 = vld [vmem:[%s3048_s5] ss:$0 sm:$0xff] }
  0x2a   : > { %2186 = vmatpush3.msra.mxu0 %v629_v9  ;;  %v634_v27 = vld [vmem:[%s3046_s25] sm:$0xff]  ;;  %s2490_s25 = smov 96  }
  0x2b   : > { %2187 = vmatprep.subr.mxu0 %v2488_v2  ;;  %v2689_v18 = vrot.slane %v755_v15, %v878_v14  ;;  %2209 = vmatpush3.bf16.msra.mxu1 %v2376_v40  ;;  %v2035_v47 = vld [vmem:[%s3003_s6] ss:$0 sm:$0xff] }
  0x2c   : > { %2188 = vmatpush3.msra.mxu0 %v628_v12  ;;  %2214 = vmatprep.subr.bf16.mxu1 %v2488_v2  ;;  %v2036_v51 = vld [vmem:[%s3005_s8] ss:$0 sm:$0xff] }
  0x2d   : > { %2189 = vmatprep.subr.mxu0 %v2488_v2 }
  0x2e   : > { %2190 = vmatpush3.msra.mxu0 %v627_v16 }
  0x2f   : > { %2191 = vmatprep.subr.mxu0 %v2488_v2 }
  0x30   : > { %2192 = vmatpush3.msra.mxu0 %v626_v17 }
  0x31   : > { %2193 = vmatprep.subr.mxu0 %v2488_v2 }
  0x32   : > { %2194 = vmatpush3.msra.mxu0 %v625_v19 }
  0x33   : > { %2195 = vmatprep.subr.mxu0 %v2488_v2 }
  0x34   : > { %2196 = vmatpush3.msra.mxu0 %v624_v20 }
  0x35   : > { %2197 = vmatprep.subr.mxu0 %v2488_v2 }
  0x36   : > { %2198 = vmatpush3.msra.mxu0 %v623_v21 }
  0x37   : > { %2199 = vmatprep.subr.mxu0 %v2488_v2 }
  0x38   : > { %2200 = vmatpush3.msra.mxu0 %v622_v22 }
  0x39   : > { %2201 = vmatprep.subr.mxu0 %v2488_v2 }
  0x3a   : > { %2202 = vmatpush3.msra.mxu0 %v621_v23 }
  0x3b   : > { %2226 = vmatprep.subr.bf16.mxu0 %v2488_v2 }
  0xa1   : > { %v617_v25 = vpop.permute.xlu0 %616 }
  0xa2   : > { %vm618_vm3 = vcmp.eq.s32.totalorder %v617_v25, %v614_v24 }
  0xa3   : > { %v2030_v26 = vsel %vm618_vm3, 1.0, %v2488_v2 }
  0xa4   : > { %2204 = vmatmul.mubr.msk.f32.vlgmr.msra.gmra.mxu0 %vm635_vm2, %v2030_v26 }
  0xa5   : > { %2228 = vmatprep.mubr.msk.bf16.mxu0 %vm2489_vm1, %v2488_v2 }
 0x164   : > { %v709_v28 = vpop.f32.mrf.mxu0 }
 0x165   : > { %v710_v30 = vadd.f32 %v709_v28, %v634_v27 }
 0x166   : > { %v2205_v31 = vpop.f32.mrf.mxu0 }
 0x167   : > { %v720_v32 = vadd.f32 %v2033_v29, %v710_v30 }
 0x169   : > { %v724_v33 = vsel %vm723_vm4, %v720_v32, 0.0 }
 0x16a   : > { %725 = vadd.xlane.f32.xlu0 %v724_v33 }
 0x1f3   : > { %v726_v34 = vpop.xlane.xlu0 %725 }
 0x1f4   : > { %v728_v35 = vmul.f32 0.03125, %v726_v34 }
 0x1f6   : > { %v729_v36 = vsub.f32 %v720_v32, %v728_v35 }
 0x1f8   : > { %v730_v37 = vmul.f32 %v729_v36, %v729_v36 }
 0x1fa   : > { %v731_v38 = vsel %vm723_vm4, %v730_v37, 0.0  ;;  %v2377_v37 = vld [vmem:[%s3006_s9 + $0x8] sm:$0xff]  }
 0x1fb   : > { %732 = vadd.xlane.f32.xlu1 %v731_v38  ;;  %v2378_v38 = vld [vmem:[%s3006_s9] sm:$0xff]  }
 0x284   : > { %v733_v41 = vpop.xlane.xlu1 %732 }
 0x285   : > { %v734_v42 = vmul.f32 0.03125, %v733_v41 }
 0x287   : > { %v735_v43 = vadd.f32 1e-12, %v734_v42 }
 0x289   : > { %2395 = vrsqrt.f32 %v735_v43 }
 0x296   : > { %v2396_v44 = vpop.eup %2395 }
 0x297   : > { %v737_v46 = vmul.f32 %v2396_v44, %v729_v36 }
 0x299   : > { %v744_v48 = vmul.f32 %v2034_v45, %v737_v46 }
 0x29b   : > { %v2739_v49 = vadd.f32 %v2035_v47, %v744_v48 }
 0x29d   : > { %v756_v50 = vpack.c.bf16 %v2739_v49, %v2739_v49 }
 0x29f   : > { %2211 = vmatmul.mubr.msk.bf16.vlgmr.msra.gmra.mxu1 %vm723_vm4, %v756_v50 }
 0x2a0   : > { %2216 = vmatprep.mubr.msk.bf16.mxu1 %vm2489_vm1, %v2488_v2 }
 0x35f   : > { %v817_v52 = vpop.f32.mrf.mxu1 }
 0x360   : > { %v818_v53 = vadd.f32 %v2036_v51, %v817_v52  ;;  %v2044_v51 = vld [vmem:[%s3007_s10] ss:$0 sm:$0xff] }
 0x361   : > { %v2212_v54 = vpop.f32.mrf.mxu1 }
 0x362   : > { %v823_v55 = vpack.c.bf16 %v818_v53, %v818_v53 }
 0x363   : > { %v820_v56 = vpop.f32.mrf.mxu1 }
 0x364   : > { %825 = vrot.lane.b32.xlu1 %v823_v55, %s2490_s25 }
 0x365   : > { %v2213_v57 = vpop.f32.mrf.mxu1 }
 0x368   : > { %884 = vrot.lane.b32.xlu1 %v823_v55, %s2491_s3 }
 0x36c   : > { %882 = vrot.lane.b32.xlu1 %v823_v55, %s2492_s24 }
 0x3d6   : > { %v826_v58 = vpop.permute.xlu1 %825 }
 0x3d7   : > { %v832_v59 = vsel %vm827_vm5, %v826_v58, 0 }
 0x3d8   : > { %2215 = vmatpush3.bf16.xpose.msra.mxu1 %v832_v59 }
 0x3d9   : > { %2220 = vmatprep.subr.bf16.mxu1 %v2488_v2 }
 0x3da   : > { %v885_v60 = vpop.permute.xlu1 %884 }
 0x3db   : > { %v890_v61 = vsel %vm827_vm5, %v885_v60, 0 }
 0x3de   : > { %v883_v62 = vpop.permute.xlu1 %882 }
 0x3df   : > { %2217 = vmatmul.mubr.msk.bf16.vlgmr.msra.gmra.mxu1 %vm827_vm5, %v823_v55 }
 0x3e0   : > { %2221 = vmatpush3.bf16.xpose.msra.mxu1 %v890_v61  ;;  %2222 = vmatprep.mubr.msk.bf16.mxu1 %vm2489_vm1, %v2488_v2 }
 0x3e1   : > { %2246 = vmatprep.subr.bf16.mxu1 %v2488_v2 }
 0x3e7   : > { %2223 = vmatmul.mubr.msk.bf16.vlgmr.msra.gmra.mxu1 %vm827_vm5, %v883_v62 }
 0x3e8   : > { %2250 = vmatprep.mubr.msk.bf16.mxu1 %vm2489_vm1, %v2488_v2 }
 0x49f   : > { %v868_v63 = vpop.f32.mrf.mxu1 }
 0x4a0   : > { %v874_v0 = vmul.f32 0.25, %v868_v63 }
 0x4a1   : > { %v2218_v1 = vpop.f32.mrf.mxu1 }
 0x4a2   : > { %v881_v3 = vadd.f32 %v2689_v18, %v874_v0  ;;  %v2379_v0 = vld [vmem:[%s3010_s13 + $0x8] sm:$0xff]  }
 0x4a3   : > { %v871_v4 = vpop.f32.mrf.mxu1  ;;  %2247 = vmatpush3.bf16.msra.mxu1 %v2379_v0 }
 0x4a4   : > { %v935_v5 = vsel %vm934_vm6, %v881_v3, -inf  ;;  %2248 = vmatprep.subr.bf16.mxu1 %v2488_v2 }
 0x4a5   : > { %936 = vmax.xlane.f32.xlu1 %v935_v5  ;;  %v2219_v6 = vpop.f32.mrf.mxu1 }
 0x4a6   : > { %v2048_v6 = vld [vmem:[%s3008_s11] ss:$0 sm:$0xff] }
 0x4a7   : > { %v926_v7 = vpop.f32.mrf.mxu1 }
 0x4a8   : > { %v932_v8 = vmul.f32 0.25, %v926_v7 }
 0x4a9   : > { %v2224_v9 = vpop.f32.mrf.mxu1 }
 0x4aa   : > { %v933_v10 = vadd.f32 %v932_v8, %v2689_v18  ;;  %v2049_v8 = vld [vmem:[%s3009_s12] ss:$0 sm:$0xff] }
 0x4ab   : > { %v929_v11 = vpop.f32.mrf.mxu1 }
 0x4ac   : > { %v938_v12 = vsel %vm934_vm6, %v933_v10, -inf }
 0x4ad   : > { %939 = vmax.xlane.f32.xlu0 %v938_v12  ;;  %v2225_v13 = vpop.f32.mrf.mxu1  ;;  %v2381_v12 = vld [vmem:[%s3012_s15 + $0x18] sm:$0xff]  }
 0x4ae   : > { %v2382_v13 = vld [vmem:[%s3012_s15 + $0x10] sm:$0xff]  }
 0x4b6   : > { %1008 = vrot.lane.b32.xlu1 %v823_v55, %s2493_s22 }
 0x52e   : > { %v937_v14 = vpop.xlane.xlu1 %936 }
 0x52f   : > { %v941_v15 = vsub.f32 %v881_v3, %v937_v14  ;;  %v2383_v14 = vld [vmem:[%s3012_s15 + $0x8] sm:$0xff]  }
 0x531   : > { %v943_v16 = vmul.f32 1.442695, %v941_v15  ;;  %v2384_v15 = vld [vmem:[%s3012_s15] sm:$0xff]  }
 0x532   : > { %v1009_v31 = vpop.permute.xlu1 %1008 }
 0x533   : > { %2397 = vpow2.f32 %v943_v16  ;;  %v1014_v33 = vsel %vm639_vm0, %v1009_v31, 0  ;;  %v2050_v16 = vld [vmem:[%s3011_s14] ss:$0 sm:$0xff] }
 0x536   : > { %v940_v17 = vpop.xlane.xlu0 %939 }
 0x537   : > { %v942_v19 = vsub.f32 %v933_v10, %v940_v17 }
 0x539   : > { %v945_v20 = vmul.f32 1.442695, %v942_v19 }
 0x53b   : > { %2399 = vpow2.f32 %v945_v20 }
 0x540   : > { %v2398_v21 = vpop.eup %2397 }
 0x541   : > { %v947_v22 = vsel %vm934_vm6, %v2398_v21, 0.0 }
 0x542   : > { %948 = vadd.xlane.f32.xlu0 %v947_v22 }
 0x548   : > { %v2400_v23 = vpop.eup %2399 }
 0x549   : > { %v950_v24 = vsel %vm934_vm6, %v2400_v23, 0.0 }
 0x54a   : > { %951 = vadd.xlane.f32.xlu0 %v950_v24 }
 0x560   : > { %958 = vrot.lane.b32.xlu0 %v823_v55, %s2494_s23 }
 0x5cb   : > { %v949_v25 = vpop.xlane.xlu0 %948 }
 0x5cc   : > { %2401 = vrcp.f32 %v949_v25 }
 0x5d3   : > { %v952_v26 = vpop.xlane.xlu0 %951 }
 0x5d4   : > { %2403 = vrcp.f32 %v952_v26 }
 0x5d7   : > { %v959_v27 = vpop.permute.xlu0 %958 }
 0x5d8   : > { %v964_v28 = vsel %vm639_vm0, %v959_v27, 0 }
 0x5d9   : > { %v2402_v29 = vpop.eup %2401  ;;  %2227 = vmatpush3.bf16.msra.mxu0 %v964_v28 }
 0x5da   : > { %2232 = vmatprep.subr.bf16.mxu0 %v2488_v2  ;;  %v955_v30 = vmul.f32 %v2402_v29, %v2398_v21 }
 0x5dc   : > { %v957_v32 = vpack.c.bf16 %v955_v30, %v955_v30 }
 0x5de   : > { %2229 = vmatmul.mubr.msk.bf16.vlgmr.msra.gmra.mxu0 %vm934_vm6, %v957_v32 }
 0x5df   : > { %2233 = vmatpush3.bf16.msra.mxu0 %v1014_v33  ;;  %2234 = vmatprep.mubr.msk.bf16.mxu0 %vm2489_vm1, %v2488_v2  ;;  %v2054_v33 = vld [vmem:[%s3013_s16] ss:$0 sm:$0xff] }
 0x5e0   : > { %2238 = vmatprep.subr.bf16.mxu0 %v2488_v2 }
 0x5e1   : > { %v2404_v34 = vpop.eup %2403 }
 0x5e2   : > { %v956_v35 = vmul.f32 %v2404_v34, %v2400_v23 }
 0x5e4   : > { %v1007_v36 = vpack.c.bf16 %v956_v35, %v956_v35 }
 0x5e6   : > { %2235 = vmatmul.mubr.msk.bf16.vlgmr.msra.gmra.mxu0 %vm934_vm6, %v1007_v36 }
 0x5e7   : > { %2242 = vmatprep.mubr.msk.bf16.mxu0 %vm2489_vm1, %v2488_v2  ;;  %2239 = vmatpush3.bf16.msra.mxu0 %v2377_v37 }
 0x5e8   : > { %2240 = vmatprep.subr.bf16.mxu0 %v2488_v2 }
 0x5eb   : > { %2241 = vmatpush3.bf16.msra.mxu0 %v2378_v38 }
 0x5ec   : > { %2254 = vmatprep.subr.bf16.mxu0 %v2488_v2 }
 0x69e   : > { %v1000_v39 = vpop.f32.mrf.mxu0 }
 0x69f   : > { %1006 = vst.msk [vmem:[#allocation2] sm:$0xff] %vm827_vm5, %v1000_v39 }
 0x6a0   : > { %v2230_v40 = vpop.f32.mrf.mxu0 }
 0x6a2   : > { %v1003_v41 = vpop.f32.mrf.mxu0 }
 0x6a4   : > { %v2231_v42 = vpop.f32.mrf.mxu0 }
 0x6a6   : > { %v1050_v43 = vpop.f32.mrf.mxu0 }
 0x6a7   : > { %1057 = vrot.lane.b32.xlu0 %v1050_v43, %s2495_s26 }
 0x6a8   : > { %v2236_v44 = vpop.f32.mrf.mxu0 }
 0x6aa   : > { %v1053_v45 = vpop.f32.mrf.mxu0 }
 0x6ac   : > { %v2237_v46 = vpop.f32.mrf.mxu0 }
 0x6ad   : > { %v2385_v46 = vld [vmem:[%s3004_s7 + $0x18] sm:$0xff]  }
 0x719   : > { %v1058_v47 = vpop.permute.xlu0 %1057 }
 0x71a   : > { %1061 = vst.msk [vmem:[#allocation2] sm:$0xff] %vm1060_vm7, %v1058_v47  ;;  %v2386_v47 = vld [vmem:[%s3004_s7 + $0x10] sm:$0xff]  }
 0x721   : > { %v1062_v48 = vld [vmem:[#allocation2] sm:$0xff] }
 0x722   : > { %v1063_v50 = vpack.c.bf16 %v1062_v48, %v1062_v48 }
 0x724   : > { %2243 = vmatmul.mubr.msk.bf16.vlgmr.msra.gmra.mxu0 %vm723_vm4, %v1063_v50 }
 0x725   : > { %2262 = vmatprep.mubr.msk.bf16.mxu0 %vm2489_vm1, %v2488_v2  ;;  %2255 = vmatpush3.bf16.msra.mxu0 %v2381_v12 }
 0x726   : > { %2256 = vmatprep.subr.bf16.mxu0 %v2488_v2 }
 0x729   : > { %2257 = vmatpush3.bf16.msra.mxu0 %v2382_v13 }
 0x72a   : > { %2258 = vmatprep.subr.bf16.mxu0 %v2488_v2 }
 0x72d   : > { %2259 = vmatpush3.bf16.msra.mxu0 %v2383_v14 }
 0x72e   : > { %2260 = vmatprep.subr.bf16.mxu0 %v2488_v2 }
 0x731   : > { %2261 = vmatpush3.bf16.msra.mxu0 %v2384_v15 }
 0x732   : > { %2280 = vmatprep.subr.bf16.mxu0 %v2488_v2 }
 0x7e4   : > { %v1124_v52 = vpop.f32.mrf.mxu0 }
 0x7e5   : > { %v1125_v53 = vadd.f32 %v2044_v51, %v1124_v52 }
 0x7e6   : > { %v2244_v54 = vpop.f32.mrf.mxu0 }
 0x7e7   : > { %v1130_v55 = vadd.f32 %v1125_v53, %v2739_v49  ;;  %v2380_v49 = vld [vmem:[%s3010_s13] sm:$0xff]  }
 0x7e8   : > { %v1127_v56 = vpop.f32.mrf.mxu0  ;;  %2249 = vmatpush3.bf16.msra.mxu1 %v2380_v49  ;;  %v2060_v53 = vld [vmem:[%s3014_s17] ss:$0 sm:$0xff] }
 0x7e9   : > { %v1133_v57 = vsel %vm723_vm4, %v1130_v55, 0.0  ;;  %2266 = vmatprep.subr.bf16.mxu1 %v2488_v2 }
 0x7ea   : > { %1134 = vadd.xlane.f32.xlu0 %v1133_v57  ;;  %v2245_v58 = vpop.f32.mrf.mxu0 }
 0x873   : > { %v1135_v59 = vpop.xlane.xlu0 %1134 }
 0x874   : > { %v1136_v60 = vmul.f32 0.03125, %v1135_v59  ;;  %v2067_v59 = vld [vmem:[%s3005_s8 + $0x1] ss:$0 sm:$0xff] }
 0x876   : > { %v1137_v61 = vsub.f32 %v1130_v55, %v1136_v60  ;;  %v2061_v55 = vld [vmem:[%s3015_s18] ss:$0 sm:$0xff] }
 0x878   : > { %v1138_v62 = vmul.f32 %v1137_v61, %v1137_v61 }
 0x87a   : > { %v1139_v63 = vsel %vm723_vm4, %v1138_v62, 0.0 }
 0x87b   : > { %1140 = vadd.xlane.f32.xlu1 %v1139_v63 }
 0x904   : > { %v1141_v1 = vpop.xlane.xlu1 %1140 }
 0x905   : > { %v1142_v3 = vmul.f32 0.03125, %v1141_v1 }
 0x907   : > { %v1143_v4 = vadd.f32 1e-12, %v1142_v3 }
 0x909   : > { %2405 = vrsqrt.f32 %v1143_v4 }
 0x916   : > { %v2406_v5 = vpop.eup %2405 }
 0x917   : > { %v1145_v7 = vmul.f32 %v2406_v5, %v1137_v61 }
 0x919   : > { %v1152_v9 = vmul.f32 %v2048_v6, %v1145_v7 }
 0x91b   : > { %v1159_v10 = vadd.f32 %v2049_v8, %v1152_v9 }
 0x91d   : > { %v1160_v11 = vpack.c.bf16 %v1159_v10, %v1159_v10 }
 0x91f   : > { %2251 = vmatmul.mubr.msk.bf16.vlgmr.msra.gmra.mxu1 %vm723_vm4, %v1160_v11 }
 0x920   : > { %2270 = vmatprep.mubr.msk.bf16.mxu1 %vm2489_vm1, %v2488_v2  ;;  %2267 = vmatpush3.bf16.msra.mxu1 %v2385_v46 }
 0x921   : > { %2268 = vmatprep.subr.bf16.mxu1 %v2488_v2 }
 0x924   : > { %2269 = vmatpush3.bf16.msra.mxu1 %v2386_v47 }
 0x925   : > { %2274 = vmatprep.subr.bf16.mxu1 %v2488_v2 }
 0x9df   : > { %v1221_v17 = vpop.f32.mrf.mxu1 }
 0x9e0   : > { %v1222_v19 = vadd.f32 %v2050_v16, %v1221_v17 }
 0x9e1   : > { %v2252_v20 = vpop.f32.mrf.mxu1 }
 0x9e2   : > { %v1227_v21 = vmul.f32 %v1222_v19, %v1222_v19 }
 0x9e3   : > { %v1224_v22 = vpop.f32.mrf.mxu1 }
 0x9e4   : > { %v1228_v23 = vmul.f32 %v1227_v21, %v1222_v19 }
 0x9e5   : > { %v2253_v24 = vpop.f32.mrf.mxu1 }
 0x9e6   : > { %v1229_v25 = vmul.f32 0.044715, %v1228_v23 }
 0x9e8   : > { %v1230_v26 = vadd.f32 %v1229_v25, %v1222_v19 }
 0x9ea   : > { %v1231_v27 = vmul.f32 0.7978846, %v1230_v26 }
 0x9ec   : > { %2407 = vtanh.f32 %v1231_v27 }
 0x9f9   : > { %v2408_v28 = vpop.eup %2407 }
 0x9fa   : > { %v1233_v29 = vadd.f32 1.0, %v2408_v28 }
 0x9fc   : > { %v1234_v30 = vmul.f32 0.5, %v1233_v29 }
 0x9fe   : > { %v1235_v31 = vmul.f32 %v1234_v30, %v1222_v19 }
 0xa00   : > { %v1236_v32 = vpack.c.bf16 %v1235_v31, %v1235_v31 }
 0xa02   : > { %2263 = vmatmul.mubr.msk.bf16.vlgmr.msra.gmra.mxu0 %vm1276_vm8, %v1236_v32 }
 0xa03   : > { %2282 = vmatprep.mubr.msk.bf16.mxu0 %vm2489_vm1, %v2488_v2 }
 0xac2   : > { %v1314_v34 = vpop.f32.mrf.mxu0 }
 0xac3   : > { %v1315_v35 = vadd.f32 %v2054_v33, %v1314_v34 }
 0xac4   : > { %v2264_v36 = vpop.f32.mrf.mxu0 }
 0xac5   : > { %v1320_v37 = vadd.f32 %v1315_v35, %v1159_v10 }
 0xac6   : > { %v1317_v38 = vpop.f32.mrf.mxu0 }
 0xac7   : > { %v1323_v39 = vsel %vm723_vm4, %v1320_v37, 0.0 }
 0xac8   : > { %1324 = vadd.xlane.f32.xlu0 %v1323_v39  ;;  %v2265_v40 = vpop.f32.mrf.mxu0 }
 0xb51   : > { %v1325_v41 = vpop.xlane.xlu0 %1324 }
 0xb52   : > { %v1326_v42 = vmul.f32 0.03125, %v1325_v41 }
 0xb54   : > { %v1327_v43 = vsub.f32 %v1320_v37, %v1326_v42 }
 0xb56   : > { %v1328_v44 = vmul.f32 %v1327_v43, %v1327_v43 }
 0xb58   : > { %v1329_v45 = vsel %vm723_vm4, %v1328_v44, 0.0  ;;  %v2388_v44 = vld [vmem:[%s3006_s9 + $0x10] sm:$0xff]  }
 0xb59   : > { %1330 = vadd.xlane.f32.xlu0 %v1329_v45 }
 0xbe2   : > { %v1331_v48 = vpop.xlane.xlu0 %1330 }
 0xbe3   : > { %v1332_v50 = vmul.f32 0.03125, %v1331_v48 }
 0xbe5   : > { %v1333_v51 = vadd.f32 1e-12, %v1332_v50 }
 0xbe7   : > { %2409 = vrsqrt.f32 %v1333_v51 }
 0xbf4   : > { %v2410_v52 = vpop.eup %2409 }
 0xbf5   : > { %v1335_v54 = vmul.f32 %v2410_v52, %v1327_v43  ;;  %v2387_v43 = vld [vmem:[%s3006_s9 + $0x18] sm:$0xff]  }
 0xbf7   : > { %v1342_v56 = vmul.f32 %v2060_v53, %v1335_v54 }
 0xbf9   : > { %v2858_v57 = vadd.f32 %v2061_v55, %v1342_v56 }
 0xbfb   : > { %v1350_v58 = vpack.c.bf16 %v2858_v57, %v2858_v57 }
 0xbfd   : > { %2271 = vmatmul.mubr.msk.bf16.vlgmr.msra.gmra.mxu1 %vm723_vm4, %v1350_v58  ;;  %v2080_v58 = vld [vmem:[%s3007_s10 + $0x1] ss:$0 sm:$0xff] }
 0xbfe   : > { %2276 = vmatprep.mubr.msk.bf16.mxu1 %vm2489_vm1, %v2488_v2 }
 0xcbd   : > { %v1413_v60 = vpop.f32.mrf.mxu1 }
 0xcbe   : > { %v1414_v61 = vadd.f32 %v2067_v59, %v1413_v60 }
 0xcbf   : > { %v2272_v62 = vpop.f32.mrf.mxu1 }
 0xcc0   : > { %v1419_v63 = vpack.c.bf16 %v1414_v61, %v1414_v61 }
 0xcc1   : > { %v1416_v0 = vpop.f32.mrf.mxu1 }
 0xcc2   : > { %1471 = vrot.lane.b32.xlu1 %v1419_v63, %s2492_s24  ;;  %1473 = vrot.lane.b32.xlu0 %v1419_v63, %s2491_s3 }
 0xcc3   : > { %v2273_v49 = vpop.f32.mrf.mxu1 }
 0xcc6   : > { %1421 = vrot.lane.b32.xlu0 %v1419_v63, %s2490_s25  ;;  %s602_s25 = sand.u32 1, %s2477_s30  }
 0xcc7   : > { %s603_s20 = scalar_lea.vmem [#allocation3], %s602_s25  ;;  %s1949_s3 = scalar_lea.sflag [#allocation4], %s602_s25 }
 0xcc8   : > { %s1961_s2 = sshll.u32 %s603_s20, 4  ;;  %s1962_s2 = int_to_ptr.vmem [resolvable:$true] %s1961_s2 }
 0xcc9   : > { %s2425_s24 = scalar_lea.vmem %s1962_s2, 16 }
 0xcca   : > { %p2426_p11 = scmp.ne.s32.totalorder %s1962_s2, %s2425_s24 }
 0xccc   : > { %p2427_p12 = pnand %p2426_p11, %p2635_p5 }
 0xcce   : > { %p2428_p13 = pneg %p2427_p12 }
 0xd34   : > { %v1474_v1 = vpop.permute.xlu0 %1473  ;;  %v1472_v6 = vpop.permute.xlu1 %1471 }
 0xd35   : > { %v1479_v3 = vsel %vm827_vm5, %v1474_v1, 0 }
 0xd36   : > { %2281 = vmatpush3.bf16.xpose.msra.mxu0 %v1479_v3 }
 0xd37   : > { %2292 = vmatprep.subr.bf16.mxu0 %v2488_v2 }
 0xd38   : > { %v1422_v4 = vpop.permute.xlu0 %1421 }
 0xd39   : > { %v1427_v5 = vsel %vm827_vm5, %v1422_v4, 0 }
 0xd3a   : > { %2275 = vmatpush3.bf16.xpose.msra.mxu1 %v1427_v5 }
 0xd3b   : > { %2286 = vmatprep.subr.bf16.mxu1 %v2488_v2 }
 0xd3d   : > { %2283 = vmatmul.mubr.msk.bf16.vlgmr.msra.gmra.mxu0 %vm827_vm5, %v1472_v6 }
 0xd3e   : > { %2294 = vmatprep.mubr.msk.bf16.mxu0 %vm2489_vm1, %v2488_v2 }
 0xd41   : > { %2277 = vmatmul.mubr.msk.bf16.vlgmr.msra.gmra.mxu1 %vm827_vm5, %v1419_v63 }
 0xd42   : > { %2288 = vmatprep.mubr.msk.bf16.mxu1 %vm2489_vm1, %v2488_v2 }
 0xdfd   : > { %v1515_v7 = vpop.f32.mrf.mxu0 }
 0xdfe   : > { %v1521_v8 = vmul.f32 0.25, %v1515_v7  ;;  %v2389_v7 = vld [vmem:[%s3010_s13 + $0x18] sm:$0xff]  }
 0xdff   : > { %v2284_v9 = vpop.f32.mrf.mxu0 }
 0xe00   : > { %v1522_v10 = vadd.f32 %v1521_v8, %v2689_v18 }
 0xe01   : > { %v1463_v11 = vpop.f32.mrf.mxu1  ;;  %v1518_v12 = vpop.f32.mrf.mxu0 }
 0xe02   : > { %v1469_v13 = vmul.f32 0.25, %v1463_v11  ;;  %v1526_v14 = vsel %vm934_vm6, %v1522_v10, -inf  ;;  %v2086_v12 = vld [vmem:[%s3008_s11 + $0x1] ss:$0 sm:$0xff] }
 0xe03   : > { %v2278_v15 = vpop.f32.mrf.mxu1  ;;  %1527 = vmax.xlane.f32.xlu1 %v1526_v14  ;;  %v2285_v16 = vpop.f32.mrf.mxu0  ;;  %v2087_v14 = vld [vmem:[%s3009_s12 + $0x1] ss:$0 sm:$0xff] }
 0xe04   : > { %v1470_v17 = vadd.f32 %v1469_v13, %v2689_v18 }
 0xe05   : > { %v1466_v19 = vpop.f32.mrf.mxu1 }
 0xe06   : > { %v1523_v20 = vsel %vm934_vm6, %v1470_v17, -inf  ;;  %v2391_v19 = vld [vmem:[%s3012_s15 + $0x38] sm:$0xff]  }
 0xe07   : > { %1524 = vmax.xlane.f32.xlu0 %v1523_v20  ;;  %v2279_v21 = vpop.f32.mrf.mxu1  ;;  %v2392_v20 = vld [vmem:[%s3012_s15 + $0x30] sm:$0xff]  }
 0xe08   : > { %v2393_v21 = vld [vmem:[%s3012_s15 + $0x28] sm:$0xff]  }
 0xe14   : > { %1596 = vrot.lane.b32.xlu1 %v1419_v63, %s2493_s22 }
 0xe8c   : > { %v1528_v22 = vpop.xlane.xlu1 %1527 }
 0xe8d   : > { %v1530_v23 = vsub.f32 %v1522_v10, %v1528_v22  ;;  %v2394_v22 = vld [vmem:[%s3012_s15 + $0x20] sm:$0xff]  }
 0xe8f   : > { %v1533_v24 = vmul.f32 1.442695, %v1530_v23  ;;  %v2093_v23 = vld [vmem:[%s3011_s14 + $0x1] ss:$0 sm:$0xff] }
 0xe90   : > { %v1525_v25 = vpop.xlane.xlu0 %1524  ;;  %v1597_v26 = vpop.permute.xlu1 %1596 }
 0xe91   : > { %2411 = vpow2.f32 %v1533_v24  ;;  %v1529_v27 = vsub.f32 %v1470_v17, %v1525_v25  ;;  %v1602_v28 = vsel %vm639_vm0, %v1597_v26, 0 }
 0xe92   : > { %2293 = vmatpush3.bf16.msra.mxu0 %v1602_v28 }
 0xe93   : > { %v1531_v29 = vmul.f32 1.442695, %v1529_v27  ;;  %2306 = vmatprep.subr.bf16.mxu0 %v2488_v2 }
 0xe95   : > { %2413 = vpow2.f32 %v1531_v29 }
 0xe9e   : > { %v2412_v18 = vpop.eup %2411 }
 0xe9f   : > { %v1538_v30 = vsel %vm934_vm6, %v2412_v18, 0.0 }
 0xea0   : > { %1539 = vadd.xlane.f32.xlu0 %v1538_v30 }
 0xea2   : > { %v2414_v31 = vpop.eup %2413 }
 0xea3   : > { %v1535_v32 = vsel %vm934_vm6, %v2414_v31, 0.0 }
 0xea4   : > { %1536 = vadd.xlane.f32.xlu0 %v1535_v32 }
 0xeba   : > { %1546 = vrot.lane.b32.xlu0 %v1419_v63, %s2494_s23  ;;  %s2496_s23 = smov [#allocation3]  }
 0xf29   : > { %v1540_v33 = vpop.xlane.xlu0 %1539 }
 0xf2a   : > { %2415 = vrcp.f32 %v1540_v33 }
 0xf2d   : > { %v1537_v34 = vpop.xlane.xlu0 %1536 }
 0xf2e   : > { %2417 = vrcp.f32 %v1537_v34 }
 0xf31   : > { %v1547_v35 = vpop.permute.xlu0 %1546 }
 0xf32   : > { %v1552_v36 = vsel %vm639_vm0, %v1547_v35, 0 }
 0xf33   : > { %2287 = vmatpush3.bf16.msra.mxu1 %v1552_v36 }
 0xf34   : > { %2298 = vmatprep.subr.bf16.mxu1 %v2488_v2 }
 0xf37   : > { %v2416_v37 = vpop.eup %2415 }
 0xf38   : > { %v1544_v38 = vmul.f32 %v2416_v37, %v2412_v18  ;;  %v2106_v37 = vld [vmem:[%s3013_s16 + $0x1] ss:$0 sm:$0xff] }
 0xf3a   : > { %v1595_v39 = vpack.c.bf16 %v1544_v38, %v1544_v38 }
 0xf3b   : > { %v2418_v40 = vpop.eup %2417 }
 0xf3c   : > { %2295 = vmatmul.mubr.msk.bf16.vlgmr.msra.gmra.mxu0 %vm934_vm6, %v1595_v39  ;;  %v1543_v41 = vmul.f32 %v2418_v40, %v2414_v31 }
 0xf3d   : > { %2310 = vmatprep.mubr.msk.bf16.mxu0 %vm2489_vm1, %v2488_v2  ;;  %2307 = vmatpush3.bf16.msra.mxu0 %v2389_v7 }
 0xf3e   : > { %v1545_v42 = vpack.c.bf16 %v1543_v41, %v1543_v41  ;;  %2308 = vmatprep.subr.bf16.mxu0 %v2488_v2 }
 0xf40   : > { %2289 = vmatmul.mubr.msk.bf16.vlgmr.msra.gmra.mxu1 %vm934_vm6, %v1545_v42 }
 0xf41   : > { %2302 = vmatprep.mubr.msk.bf16.mxu1 %vm2489_vm1, %v2488_v2  ;;  %2299 = vmatpush3.bf16.msra.mxu1 %v2387_v43 }
 0xf42   : > { %2300 = vmatprep.subr.bf16.mxu1 %v2488_v2 }
 0xf45   : > { %2301 = vmatpush3.bf16.msra.mxu1 %v2388_v44 }
 0xf46   : > { %2314 = vmatprep.subr.bf16.mxu1 %v2488_v2 }
 0xffc   : > { %v1638_v45 = vpop.f32.mrf.mxu0 }
 0xffd   : > { %1645 = vrot.lane.b32.xlu1 %v1638_v45, %s2495_s26  ;;  %s2429_s26 = sshll.u32 %s2496_s23, 4  ;;  %s2430_s26 = int_to_ptr.vmem [resolvable:$false] %s2429_s26 }
 0xffe   : > { %v2296_v46 = vpop.f32.mrf.mxu0  ;;  %s2431_s1 = scalar_lea.vmem %s2430_s26, 32  ;;  %p2432_p0 = scmp.lt.s32.totalorder %s1962_s2, %s2430_s26 }
 0xfff   : > { %p2433_p1 = scmp.lt.s32.totalorder %s2431_s1, %s2425_s24 }
0x1000   : > { %v1588_v47 = vpop.f32.mrf.mxu1  ;;  %v1641_v48 = vpop.f32.mrf.mxu0 }
0x1001   : > { %1594 = vst.msk [vmem:[#allocation2] sm:$0xff] %vm827_vm5, %v1588_v47  ;;  %p2434_p2 = por %p2433_p1, %p2432_p0 }
0x1002   : > { %v2290_v50 = vpop.f32.mrf.mxu1  ;;  %v2297_v51 = vpop.f32.mrf.mxu0 }
0x1003   : > { %p2435_p3 = pnand %p2434_p2, %p2428_p13 }
0x1004   : > { %v1591_v52 = vpop.f32.mrf.mxu1 }
0x1006   : > { %v2291_v53 = vpop.f32.mrf.mxu1 }
0x106f   : > { %v1646_v54 = vpop.permute.xlu1 %1645 }
0x1070   : > { %1648 = vst.msk [vmem:[#allocation2] sm:$0xff] %vm1060_vm7, %v1646_v54 }
0x1077   : > { %v1649_v55 = vld [vmem:[#allocation2] sm:$0xff] }
0x1078   : > { %v1650_v56 = vpack.c.bf16 %v1649_v55, %v1649_v55  ;;  %v2114_v55 = vld [vmem:[%s3014_s17 + $0x1] ss:$0 sm:$0xff] }
0x107a   : > { %2303 = vmatmul.mubr.msk.bf16.vlgmr.msra.gmra.mxu1 %vm723_vm4, %v1650_v56 }
0x107b   : > { %2322 = vmatprep.mubr.msk.bf16.mxu1 %vm2489_vm1, %v2488_v2  ;;  %2315 = vmatpush3.bf16.msra.mxu1 %v2391_v19 }
0x107c   : > { %2316 = vmatprep.subr.bf16.mxu1 %v2488_v2 }
0x107f   : > { %2317 = vmatpush3.bf16.msra.mxu1 %v2392_v20 }
0x1080   : > { %2318 = vmatprep.subr.bf16.mxu1 %v2488_v2 }
0x1083   : > { %2319 = vmatpush3.bf16.msra.mxu1 %v2393_v21 }
0x1084   : > { %2320 = vmatprep.subr.bf16.mxu1 %v2488_v2 }
0x1087   : > { %2321 = vmatpush3.bf16.msra.mxu1 %v2394_v22 }
0x113a   : > { %v1713_v59 = vpop.f32.mrf.mxu1 }
0x113b   : > { %v1714_v60 = vadd.f32 %v2080_v58, %v1713_v59  ;;  %v2115_v58 = vld [vmem:[%s3015_s18 + $0x1] ss:$0 sm:$0xff] }
0x113c   : > { %v2304_v61 = vpop.f32.mrf.mxu1 }
0x113d   : > { %v1719_v62 = vadd.f32 %v1714_v60, %v2858_v57  ;;  %v2390_v57 = vld [vmem:[%s3010_s13 + $0x10] sm:$0xff]  }
0x113e   : > { %v1716_v63 = vpop.f32.mrf.mxu1  ;;  %2309 = vmatpush3.bf16.msra.mxu0 %v2390_v57 }
0x113f   : > { %v1724_v0 = vsel %vm723_vm4, %v1719_v62, 0.0 }
0x1140   : > { %1725 = vadd.xlane.f32.xlu1 %v1724_v0  ;;  %v2305_v49 = vpop.f32.mrf.mxu1 }
0x11c9   : > { %v1726_v1 = vpop.xlane.xlu1 %1725 }
0x11ca   : > { %v1727_v3 = vmul.f32 0.03125, %v1726_v1 }
0x11cc   : > { %v1728_v4 = vsub.f32 %v1719_v62, %v1727_v3 }
0x11ce   : > { %v1729_v5 = vmul.f32 %v1728_v4, %v1728_v4 }
0x11d0   : > { %v1730_v6 = vsel %vm723_vm4, %v1729_v5, 0.0 }
0x11d1   : > { %1731 = vadd.xlane.f32.xlu0 %v1730_v6 }
0x125a   : > { %v1732_v8 = vpop.xlane.xlu0 %1731 }
0x125b   : > { %v1733_v9 = vmul.f32 0.03125, %v1732_v8 }
0x125d   : > { %v1734_v10 = vadd.f32 1e-12, %v1733_v9 }
0x125f   : > { %2419 = vrsqrt.f32 %v1734_v10 }
0x126c   : > { %v2420_v11 = vpop.eup %2419 }
0x126d   : > { %v1736_v13 = vmul.f32 %v2420_v11, %v1728_v4 }
0x126f   : > { %v1743_v15 = vmul.f32 %v2086_v12, %v1736_v13 }
0x1271   : > { %v1750_v16 = vadd.f32 %v2087_v14, %v1743_v15 }
0x1273   : > { %v1751_v17 = vpack.c.bf16 %v1750_v16, %v1750_v16 }
0x1275   : > { %2311 = vmatmul.mubr.msk.bf16.vlgmr.msra.gmra.mxu0 %vm723_vm4, %v1751_v17 }
0x1335   : > { %v1814_v24 = vpop.f32.mrf.mxu0 }
0x1336   : > { %v1815_v25 = vadd.f32 %v2093_v23, %v1814_v24 }
0x1337   : > { %v2312_v26 = vpop.f32.mrf.mxu0 }
0x1338   : > { %v1820_v27 = vmul.f32 %v1815_v25, %v1815_v25 }
0x1339   : > { %v1817_v28 = vpop.f32.mrf.mxu0 }
0x133a   : > { %v1821_v29 = vmul.f32 %v1820_v27, %v1815_v25 }
0x133b   : > { %v2313_v18 = vpop.f32.mrf.mxu0 }
0x133c   : > { %v1822_v30 = vmul.f32 0.044715, %v1821_v29 }
0x133e   : > { %v1823_v31 = vadd.f32 %v1822_v30, %v1815_v25 }
0x1340   : > { %v1824_v32 = vmul.f32 0.7978846, %v1823_v31 }
0x1342   : > { %2421 = vtanh.f32 %v1824_v32 }
0x134f   : > { %v2422_v2 = vpop.eup %2421 }
0x1350   : > { %v1826_v33 = vadd.f32 1.0, %v2422_v2 }
0x1352   : > { %v1827_v34 = vmul.f32 0.5, %v1826_v33 }
0x1354   : > { %v1828_v35 = vmul.f32 %v1827_v34, %v1815_v25 }
0x1356   : > { %v1829_v36 = vpack.c.bf16 %v1828_v35, %v1828_v35 }
0x1358   : > { %2323 = vmatmul.mubr.msk.bf16.vlgmr.msra.gmra.mxu1 %vm1276_vm8, %v1829_v36 }
0x1418   : > { %v1908_v38 = vpop.f32.mrf.mxu1 }
0x1419   : > { %v1909_v39 = vadd.f32 %v2106_v37, %v1908_v38 }
0x141a   : > { %v2324_v40 = vpop.f32.mrf.mxu1 }
0x141b   : > { %v1914_v41 = vadd.f32 %v1909_v39, %v1750_v16 }
0x141c   : > { %v1911_v42 = vpop.f32.mrf.mxu1 }
0x141d   : > { %v1919_v43 = vsel %vm723_vm4, %v1914_v41, 0.0 }
0x141e   : > { %1920 = vadd.xlane.f32.xlu1 %v1919_v43  ;;  %v2325_v44 = vpop.f32.mrf.mxu1 }
0x14a7   : > { %v1921_v45 = vpop.xlane.xlu1 %1920 }
0x14a8   : > { %v1922_v46 = vmul.f32 0.03125, %v1921_v45 }
0x14aa   : > { %v1923_v47 = vsub.f32 %v1914_v41, %v1922_v46 }
0x14ac   : > { %v1924_v48 = vmul.f32 %v1923_v47, %v1923_v47 }
0x14ae   : > { %v1925_v50 = vsel %vm723_vm4, %v1924_v48, 0.0 }
0x14af   : > { %1926 = vadd.xlane.f32.xlu0 %v1925_v50 }
0x1538   : > { %v1927_v51 = vpop.xlane.xlu0 %1926 }
0x1539   : > { %v1928_v52 = vmul.f32 0.03125, %v1927_v51 }
0x153b   : > { %v1929_v53 = vadd.f32 1e-12, %v1928_v52 }
0x153d   : > { %2423 = vrsqrt.f32 %v1929_v53 }
0x154a   : > { %v2424_v54 = vpop.eup %2423 }
0x154b   : > { %v1931_v56 = vmul.f32 %v2424_v54, %v1923_v47 }
0x154d   : > { %v1938_v59 = vmul.f32 %v2114_v55, %v1931_v56 }
0x154f   : > { %v1945_v60 = vadd.f32 %v2115_v58, %v1938_v59 }
0x1551   : > { %1947 = vst.msk [vmem:[%s603_s20] sm:$0x1] %vm1946_vm9, %v1945_v60 }
0x1552   : > { %2438 = shalt.err (!%p2435_p3)
}
0x1553   : > { %s2439_s5 = scalar_lea.hbm %s1959_s4, 16  ;;  %s2443_s20 = scalar_lea.hbm %s3051_s27, 32 }
0x1554   : > { %p2440_p4 = scmp.ne.s32.totalorder %s1959_s4, %s2439_s5  ;;  %p2444_p9 = scmp.lt.s32.totalorder %s1959_s4, %s3051_s27 }
0x1555   : > { %p2445_p10 = scmp.lt.s32.totalorder %s2443_s20, %s2439_s5 }
0x1556   : > { %p2441_p7 = pnand %p2440_p4, %p2635_p5 }
0x1557   : > { %p2446_p11 = por %p2445_p10, %p2444_p9 }
0x1558   : > { %p2442_p8 = pneg %p2441_p7 }
0x155a   : > { %p2447_p12 = pnand %p2446_p11, %p2442_p8 }
0x155c   : > { %2450 = shalt.err (!%p2447_p12)
}
0x155d   : > { %2326 = dma.vmem_to_hbm [thread:$0]  (%p2635_p5), %s1962_s2, 16, %s1959_s4, %s1949_s3  }
0x155e PF: > { %s3052_s21 = sld [smem:[#allocation8_spill]] }
0x155f   : > { %s3053_s24 = sld [smem:[#allocation6_spill]] }
0x1564   : > { %p2332_p13 = scmp.ge.s32.totalorder %s3052_s21, 2 }
0x1565   : > { %s1973_s26 = sand.u32 1, %s3053_s24  }
0x1566   : > { %p2329_p0 = pnand %p2332_p13, %p2639_p6  ;;  %s1974_s1 = scalar_lea.sflag [#allocation4], %s1973_s26 }
0x1568   : > { %p2330_p1 = pneg %p2329_p0 }
0x156a   : > { %2468 = dma.done.wait (%p2330_p1), %s1974_s1, 16  }
0x156b   : > { %2470 = vsyncadd (%p2330_p1), %s1974_s1, 4294967280  ;;  %s3055_s21 = sld [smem:[#allocation9_spill]]  ;;  %s3058_s0 = smov %s2477_s30 }
0x156c   : > { %s3056_s5 = sld [smem:[#allocation7_spill]] }
0x156d   : > { %s3057_s20 = sld [smem:[#allocation10_spill]] }
0x1571   : > { %p29_p2 = scmp.ge.s32.totalorder %s3055_s21, 4  }
0x1572   : > { %s3059_s30 = smov %s3056_s5 }
0x1573   :  { %31 = sbr.rel (!%p29_p2) target bundleno = 11 (0xb), region = 146 }
0x1578   :  { %1978 = vsyncpa [#allocation4], 1 }
0x1579   :  { %1980 = vsyncpa [#allocation4 + $0x1], 1 }

</bundles_post_ra>
